<compile_context>
chip_gen: v6e
topology: v6e:2x2x1
jax: 0.10.0
libtpu: 0.0.40
codegen_flags: <defaults>
</compile_context>

<pallas_src>
import functools
import math

import numpy as np
import jax
import jax.numpy as jnp
from jax import lax
from jax.experimental import pallas as pl
from jax.experimental.pallas import tpu as pltpu


_LN_EPS = 1e-5  # torch.nn.LayerNorm default


# ---------------------------------------------------------------------------
# in-kernel helpers
# ---------------------------------------------------------------------------

def _layernorm_f32(x, gamma, beta):
    mean = jnp.mean(x, axis=-1, keepdims=True)
    var = jnp.mean(jnp.square(x - mean), axis=-1, keepdims=True)
    return (x - mean) * lax.rsqrt(var + _LN_EPS) * gamma + beta


def _gelu_exact_f32(x):
    # erf-based GELU == torch.nn.GELU() default
    return 0.5 * x * (1.0 + lax.erf(x * (1.0 / math.sqrt(2.0))))


# ---------------------------------------------------------------------------
# Pallas kernels
# ---------------------------------------------------------------------------

def _attn_block_kernel(x_ref, g_ref, b_ref, wqkv_ref, pos_ref, ul_ref, lr_ref,
                       wout_ref, bout_ref, o_ref, *,
                       heads, head_dim, ws2, wchunk, nw, nww, shifted, scale,
                       matmul_dtype, approx_recip):
    # x_ref: (wchunk, ws2, dim) -- `wchunk` whole windows (window-major token order)
    inner = heads * head_dim
    dim = x_ref.shape[-1]
    n_tok = wchunk * ws2

    x2d = x_ref[...].reshape(n_tok, dim).astype(jnp.float32)
    z = _layernorm_f32(x2d, g_ref[...].astype(jnp.float32),
                       b_ref[...].astype(jnp.float32))

    # fused QKV projection (single lane-dense matmul, f32 accumulation)
    qkv = jnp.dot(z.astype(matmul_dtype), wqkv_ref[...],
                  preferred_element_type=jnp.float32)          # (n_tok, 3*inner)
    qkv3 = qkv.reshape(wchunk, ws2, 3 * inner)

    # per-window additive bias built in VMEM: rel-pos bias + shift masks selected by
    # the global window indices covered by this grid step (wchunk divides nw, so a
    # chunk never straddles a batch image).
    bias = pos_ref[...].astype(jnp.float32)[None]              # (1, ws2, ws2)
    if shifted:
        w_base = (pl.program_id(0) * wchunk) % nw
        w_ids = w_base + lax.broadcasted_iota(jnp.int32, (wchunk, 1, 1), 0)
        ul_sel = w_ids >= (nw - nww)            # bottom row of windows
        lr_sel = (w_ids % nww) == (nww - 1)     # right column of windows
        bias = (bias
                + jnp.where(ul_sel, ul_ref[...][None], 0.0)
                + jnp.where(lr_sel, lr_ref[...][None], 0.0))   # (wchunk, ws2, ws2)

    outs = []
    for h in range(heads):                       # small static unroll
        qh = qkv3[:, :, h * head_dim:(h + 1) * head_dim]
        kh = qkv3[:, :, inner + h * head_dim:inner + (h + 1) * head_dim]
        vh = qkv3[:, :, 2 * inner + h * head_dim:2 * inner + (h + 1) * head_dim]
        dots = jnp.einsum('wid,wjd->wij',
                          qh.astype(matmul_dtype), kh.astype(matmul_dtype),
                          preferred_element_type=jnp.float32)
        dots = dots * scale + bias
        dots = dots - jnp.max(dots, axis=-1, keepdims=True)
        p = jnp.exp(dots)
        denom = jnp.sum(p, axis=-1, keepdims=True)
        if approx_recip:
            p = p * pl.reciprocal(denom, approx=True)          # EUP slot, ~free
        else:
            p = p / denom
        outs.append(jnp.einsum('wij,wjd->wid',
                               p.astype(matmul_dtype), vh.astype(matmul_dtype),
                               preferred_element_type=jnp.float32))

    attn = jnp.concatenate(outs, axis=-1).reshape(n_tok, inner)  # merged heads
    y = jnp.dot(attn.astype(matmul_dtype), wout_ref[...],
                preferred_element_type=jnp.float32)
    y = y + bout_ref[...].astype(jnp.float32) + x2d              # to_out bias + residual
    o_ref[...] = y.reshape(wchunk, ws2, dim).astype(o_ref.dtype)


def _ln_ffn_residual_kernel(x_ref, g_ref, b_ref, w1_ref, b1_ref, w2_ref, b2_ref,
                            o_ref, *, matmul_dtype):
    x = x_ref[...].astype(jnp.float32)
    z = _layernorm_f32(x, g_ref[...].astype(jnp.float32), b_ref[...].astype(jnp.float32))
    h = jnp.dot(z.astype(matmul_dtype), w1_ref[...],
                preferred_element_type=jnp.float32) + b1_ref[...].astype(jnp.float32)
    h = _gelu_exact_f32(h)
    y = jnp.dot(h.astype(matmul_dtype), w2_ref[...],
                preferred_element_type=jnp.float32) + b2_ref[...].astype(jnp.float32)
    o_ref[...] = (y + x).astype(o_ref.dtype)


# ---------------------------------------------------------------------------
# tiling / compiler-param helpers
# ---------------------------------------------------------------------------

def _vmem_cap_bytes():
    try:
        return int(pltpu.get_tpu_info().vmem_capacity_bytes)
    except Exception:
        return 64 << 20     # conservative (v7x per-TC VMEM)


def _mosaic_params(vmem_bytes_estimate):
    cap = int(_vmem_cap_bytes() * 0.85)
    limit = int(min(max(2 * vmem_bytes_estimate + (4 << 20), 32 << 20), cap))
    return pltpu.CompilerParams(dimension_semantics=("parallel",),
                                vmem_limit_bytes=limit)


def _pick_wchunk(nw, ws2, max_tokens):
    """Largest divisor of nw whose token count fits the budget (prefer 8-aligned)."""
    divs = [c for c in range(1, nw + 1) if nw % c == 0 and c * ws2 <= max_tokens]
    if not divs:
        return 1
    pref = [c for c in divs if (c * ws2) % 8 == 0]
    return max(pref) if pref else max(divs)


def _pick_token_tile(n_tok, tm_req):
    """Largest multiple-of-8 divisor of n_tok <= tm_req (avoids jnp.pad); else pad."""
    hi = max(8, min(int(tm_req), n_tok))
    hi -= hi % 8
    hi = max(hi, 8)
    for t in range(hi, 7, -8):
        if n_tok % t == 0:
            return t, n_tok
    return hi, pl.cdiv(n_tok, hi) * hi


# ---------------------------------------------------------------------------
# pallas_call wrappers
# ---------------------------------------------------------------------------

def window_attention_block(x_win, ln_g, ln_b, w_qkv, w_out, b_out,
                           pos_bias, ul_mask, lr_mask, *,
                           heads, head_dim, nw, nww, shifted, scale,
                           matmul_dtype, attn_tokens=512):
    # x_win: (b*nw, ws2, dim) in window-major order, shifted frame.
    bw, ws2, dim = x_win.shape
    inner = heads * head_dim
    wchunk = _pick_wchunk(nw, ws2, attn_tokens)
    grid = (bw // wchunk,)
    n_tok = wchunk * ws2

    itm = np.dtype(matmul_dtype).itemsize
    xbytes = np.dtype(x_win.dtype).itemsize
    wqkv_c = w_qkv.astype(matmul_dtype)
    wout_c = w_out.astype(matmul_dtype)
    wbytes = (dim * 3 * inner + inner * dim) * itm + (3 * ws2 * ws2 + 3 * dim) * 4
    est = (4 * n_tok * dim * xbytes              # in + out blocks, double-buffered
           + 2 * wbytes                          # resident weights (double-buffered)
           + n_tok * 3 * inner * 4               # qkv intermediate (f32)
           + heads * wchunk * ws2 * ws2 * 4      # attention scores
           + n_tok * inner * 4)                  # merged head output

    approx_recip = np.dtype(matmul_dtype) != np.dtype(jnp.float32)
    kernel = functools.partial(
        _attn_block_kernel, heads=heads, head_dim=head_dim, ws2=ws2, wchunk=wchunk,
        nw=nw, nww=nww, shifted=shifted, scale=scale,
        matmul_dtype=matmul_dtype, approx_recip=approx_recip)

    total_tok = bw * ws2
    flops = (2 * total_tok * dim * 3 * inner
             + 4 * bw * heads * ws2 * ws2 * head_dim
             + 2 * total_tok * inner * dim)
    out = pl.pallas_call(
        kernel,
        out_shape=jax.ShapeDtypeStruct((bw, ws2, dim), x_win.dtype),
        grid_spec=pltpu.PrefetchScalarGridSpec(
            num_scalar_prefetch=0,
            grid=grid,
            in_specs=[
                pl.BlockSpec((wchunk, ws2, dim), lambda i: (i, 0, 0)),
                pl.BlockSpec((1, dim), lambda i: (0, 0)),
                pl.BlockSpec((1, dim), lambda i: (0, 0)),
                pl.BlockSpec((dim, 3 * inner), lambda i: (0, 0)),
                pl.BlockSpec((ws2, ws2), lambda i: (0, 0)),
                pl.BlockSpec((ws2, ws2), lambda i: (0, 0)),
                pl.BlockSpec((ws2, ws2), lambda i: (0, 0)),
                pl.BlockSpec((inner, dim), lambda i: (0, 0)),
                pl.BlockSpec((1, dim), lambda i: (0, 0)),
            ],
            out_specs=pl.BlockSpec((wchunk, ws2, dim), lambda i: (i, 0, 0)),
        ),
        compiler_params=_mosaic_params(est),
        cost_estimate=pl.CostEstimate(
            flops=int(flops),
            transcendentals=int(bw * heads * ws2 * ws2),
            bytes_accessed=int(2 * total_tok * dim * xbytes + wbytes)),
    )(x_win, ln_g.reshape(1, dim), ln_b.reshape(1, dim), wqkv_c,
      pos_bias, ul_mask, lr_mask, wout_c, b_out.reshape(1, dim))
    return out


def ln_ffn_residual(x2d, gamma, beta, w1, b1, w2, b2, *, tm, matmul_dtype):
    n, d = x2d.shape
    hdim = w1.shape[1]
    tm, n_pad = _pick_token_tile(n, tm)
    xp = jnp.pad(x2d, ((0, n_pad - n), (0, 0))) if n_pad != n else x2d
    itm = np.dtype(matmul_dtype).itemsize
    xbytes = np.dtype(x2d.dtype).itemsize
    w1c = w1.astype(matmul_dtype)
    w2c = w2.astype(matmul_dtype)
    wbytes = (w1c.size + w2c.size) * itm + (hdim + 3 * d) * 4
    est = 4 * tm * d * xbytes + tm * hdim * 4 + 2 * wbytes
    out = pl.pallas_call(
        functools.partial(_ln_ffn_residual_kernel, matmul_dtype=matmul_dtype),
        out_shape=jax.ShapeDtypeStruct((n_pad, d), x2d.dtype),
        grid_spec=pltpu.PrefetchScalarGridSpec(
            num_scalar_prefetch=0,
            grid=(n_pad // tm,),
            in_specs=[
                pl.BlockSpec((tm, d), lambda i: (i, 0)),
                pl.BlockSpec((1, d), lambda i: (0, 0)),
                pl.BlockSpec((1, d), lambda i: (0, 0)),
                pl.BlockSpec((d, hdim), lambda i: (0, 0)),
                pl.BlockSpec((1, hdim), lambda i: (0, 0)),
                pl.BlockSpec((hdim, d), lambda i: (0, 0)),
                pl.BlockSpec((1, d), lambda i: (0, 0)),
            ],
            out_specs=pl.BlockSpec((tm, d), lambda i: (i, 0)),
        ),
        compiler_params=_mosaic_params(est),
        cost_estimate=pl.CostEstimate(flops=4 * n_pad * d * hdim,
                                      transcendentals=n_pad * hdim,
                                      bytes_accessed=2 * n_pad * d * xbytes + wbytes),
    )(xp, gamma.reshape(1, d), beta.reshape(1, d), w1c, b1.reshape(1, hdim),
      w2c, b2.reshape(1, d))
    return out[:n]


# ---------------------------------------------------------------------------
# bias / mask construction (parameter-sized, XLA)
# ---------------------------------------------------------------------------

def _build_bias_and_masks(pos_embedding, ws, shifted, relative_pos_embedding):
    ws2 = ws * ws
    if relative_pos_embedding:
        idx = np.array([[xx, yy] for xx in range(ws) for yy in range(ws)])
        rel = idx[None, :, :] - idx[:, None, :] + ws - 1          # (ws2, ws2, 2)
        pos_bias = pos_embedding[rel[..., 0], rel[..., 1]]
    else:
        pos_bias = pos_embedding                                   # (ws2, ws2)
    pos_bias = pos_bias.astype(jnp.float32)
    if shifted:
        disp = ws // 2
        ninf = float('-inf')
        ul = np.zeros((ws2, ws2), np.float32)
        ul[-disp * ws:, :-disp * ws] = ninf
        ul[:-disp * ws, -disp * ws:] = ninf
        lr = np.zeros((ws, ws, ws, ws), np.float32)
        lr[:, -disp:, :, :-disp] = ninf
        lr[:, :-disp, :, -disp:] = ninf
        lr = lr.reshape(ws2, ws2)
        return pos_bias, jnp.asarray(ul), jnp.asarray(lr)
    zeros = jnp.zeros((ws2, ws2), jnp.float32)
    return pos_bias, zeros, zeros


# ---------------------------------------------------------------------------
# full block forward
# ---------------------------------------------------------------------------

def swin_transformer_block(x, params, *, heads, head_dim, window_size, shifted,
                           relative_pos_embedding, tm=512, attn_tokens=512,
                           matmul_dtype=jnp.bfloat16):
    b, n_h, n_w, dim = x.shape
    ws = window_size
    assert n_h % ws == 0 and n_w % ws == 0
    nwh, nww = n_h // ws, n_w // ws
    nw = nwh * nww
    ws2 = ws * ws
    n_tok = b * n_h * n_w
    scale = head_dim ** (-0.5)
    disp = ws // 2

    # ---- layout plumbing (single pass of the dim-wide activation) ----
    # LayerNorm / residual are per-token so they commute with the cyclic shift and the
    # window partition; do both once up front and invert once at the end.
    x_s = jnp.roll(x, (-disp, -disp), axis=(1, 2)) if shifted else x
    x_win = (x_s.reshape(b, nwh, ws, nww, ws, dim)
                .transpose(0, 1, 3, 2, 4, 5)
                .reshape(b * nw, ws2, dim))

    pos_bias, ul_mask, lr_mask = _build_bias_and_masks(
        params['pos_embedding'], ws, shifted, relative_pos_embedding)

    # ---- attention block: Residual(PreNorm(WindowAttention)), fully fused ----
    y_win = window_attention_block(
        x_win, params['ln1_g'], params['ln1_b'], params['w_qkv'],
        params['w_out'], params['b_out'], pos_bias, ul_mask, lr_mask,
        heads=heads, head_dim=head_dim, nw=nw, nww=nww, shifted=shifted,
        scale=scale, matmul_dtype=matmul_dtype, attn_tokens=attn_tokens)

    # ---- MLP block: Residual(PreNorm(FeedForward)) -- per-token, layout agnostic ----
    out2d = ln_ffn_residual(y_win.reshape(n_tok, dim),
                            params['ln2_g'], params['ln2_b'],
                            params['w1'], params['b1'], params['w2'], params['b2'],
                            tm=tm, matmul_dtype=matmul_dtype)

    # ---- inverse layout plumbing ----
    out = (out2d.reshape(b, nwh, nww, ws, ws, dim)
                 .transpose(0, 1, 3, 2, 4, 5)
                 .reshape(b, n_h, n_w, dim))
    if shifted:
        out = jnp.roll(out, (disp, disp), axis=(1, 2))
    return out


# ---------------------------------------------------------------------------
# pure-JAX reference (mirrors the PyTorch module op-for-op)
# ---------------------------------------------------------------------------

def _window_partition(t, ws, heads, head_dim):
    b, nh, nw_, _ = t.shape
    nwh, nww = nh // ws, nw_ // ws
    t = t.reshape(b, nwh, ws, nww, ws, heads, head_dim)
    t = t.transpose(0, 5, 1, 3, 2, 4, 6)
    return t.reshape(b, heads, nwh * nww, ws * ws, head_dim)


def _window_merge(t, ws, nwh, nww):
    b, heads, _, _, d = t.shape
    t = t.reshape(b, heads, nwh, nww, ws, ws, d)
    t = t.transpose(0, 2, 4, 3, 5, 1, 6)
    return t.reshape(b, nwh * ws, nww * ws, heads * d)


def _reference_block(x, params, *, heads, head_dim, window_size, shifted,
                     relative_pos_embedding):
    hp = functools.partial(jnp.einsum, precision=lax.Precision.HIGHEST)
    b, n_h, n_w, dim = x.shape
    ws = window_size
    nwh, nww = n_h // ws, n_w // ws
    disp = ws // 2
    scale = head_dim ** (-0.5)

    def ln(t, g, bb):
        mu = jnp.mean(t, axis=-1, keepdims=True)
        var = jnp.mean(jnp.square(t - mu), axis=-1, keepdims=True)
        return (t - mu) / jnp.sqrt(var + _LN_EPS) * g + bb

    # attention block
    z = ln(x, params['ln1_g'], params['ln1_b'])
    if shifted:
        z = jnp.roll(z, (-disp, -disp), axis=(1, 2))
    qkv = hp('xyzc,cf->xyzf', z, params['w_qkv'])
    q, k, v = jnp.split(qkv, 3, axis=-1)
    q = _window_partition(q, ws, heads, head_dim)
    k = _window_partition(k, ws, heads, head_dim)
    v = _window_partition(v, ws, heads, head_dim)
    dots = hp('bhwid,bhwjd->bhwij', q, k) * scale
    pos_bias, ul, lr = _build_bias_and_masks(params['pos_embedding'], ws, shifted,
                                             relative_pos_embedding)
    dots = dots + pos_bias
    if shifted:
        dots = dots.at[:, :, -nww:].add(ul)
        dots = dots.at[:, :, nww - 1::nww].add(lr)
    attn = jax.nn.softmax(dots, axis=-1)
    out = hp('bhwij,bhwjd->bhwid', attn, v)
    out = _window_merge(out, ws, nwh, nww)
    out = hp('xyzc,cf->xyzf', out, params['w_out']) + params['b_out']
    if shifted:
        out = jnp.roll(out, (disp, disp), axis=(1, 2))
    x = x + out

    # mlp block
    z = ln(x, params['ln2_g'], params['ln2_b'])
    h = hp('xyzc,cf->xyzf', z, params['w1']) + params['b1']
    h = 0.5 * h * (1.0 + lax.erf(h / jnp.sqrt(2.0)))
    return x + hp('xyzc,cf->xyzf', h, params['w2']) + params['b2']


# ---------------------------------------------------------------------------
# test
# ---------------------------------------------------------------------------

if __name__ == "__main__":
    B, N_H, N_W = 2, 8, 8
    DIM, HEADS, HEAD_DIM, MLP_DIM = 32, 2, 16, 64
    WINDOW, SHIFTED, REL_POS = 4, True, True
    INNER = HEADS * HEAD_DIM

    key = jax.random.PRNGKey(0)
    ks = jax.random.split(key, 10)

    def linear_init(kw, kb, fan_in, shape_w, shape_b=None):
        lim = 1.0 / math.sqrt(fan_in)
        w = jax.random.uniform(kw, shape_w, jnp.float32, -lim, lim)
        bret = (jax.random.uniform(kb, shape_b, jnp.float32, -lim, lim)
                if shape_b is not None else None)
        return w, bret

    w_qkv, _ = linear_init(ks[0], ks[1], DIM, (DIM, 3 * INNER))          # bias=False
    w_out, b_out = linear_init(ks[2], ks[3], INNER, (INNER, DIM), (DIM,))
    w1, b1 = linear_init(ks[4], ks[5], DIM, (DIM, MLP_DIM), (MLP_DIM,))
    w2, b2 = linear_init(ks[6], ks[7], MLP_DIM, (MLP_DIM, DIM), (DIM,))
    pos_emb = jax.random.normal(ks[8], (2 * WINDOW - 1, 2 * WINDOW - 1), jnp.float32)
    x = jax.random.normal(ks[9], (B, N_H, N_W, DIM), jnp.float32)

    params = dict(
        ln1_g=jnp.ones((DIM,), jnp.float32), ln1_b=jnp.zeros((DIM,), jnp.float32),
        ln2_g=jnp.ones((DIM,), jnp.float32), ln2_b=jnp.zeros((DIM,), jnp.float32),
        w_qkv=w_qkv, w_out=w_out, b_out=b_out,
        w1=w1, b1=b1, w2=w2, b2=b2, pos_embedding=pos_emb)

    cfg = dict(heads=HEADS, head_dim=HEAD_DIM, window_size=WINDOW,
               shifted=SHIFTED, relative_pos_embedding=REL_POS)

    ref = _reference_block(x, params, **cfg)

    # exact-precision path (f32 on the MXU, exact softmax division) — tight tolerance
    out = swin_transformer_block(x, params, matmul_dtype=jnp.float32, **cfg)
    out = jax.block_until_ready(out)
    assert out.shape == x.shape
    err = float(jnp.max(jnp.abs(out - ref)))
    assert jnp.allclose(out, ref, atol=1e-4, rtol=1e-4), f"f32 path mismatch: {err}"

    # default fast path: bf16 MXU inputs / f32 accumulation (looser tolerance by design)
    out_bf16 = swin_transformer_block(x, params, **cfg)
    out_bf16 = jax.block_until_ready(out_bf16)
    err_bf16 = float(jnp.max(jnp.abs(out_bf16 - ref)))
    assert jnp.allclose(out_bf16, ref, atol=1e-1, rtol=1e-1), \
        f"bf16 path mismatch: {err_bf16}"

    print("KERNEL_OK")
</pallas_src>

<mosaic_0001>
module attributes {stable_mosaic.version = 11 : i64} {
  func.func @_attn_block_kernel(%arg0: i32, %arg1: memref<4x16x32xf32, #tpu.memory_space<vmem>>, %arg2: memref<1x32xf32, #tpu.memory_space<vmem>>, %arg3: memref<1x32xf32, #tpu.memory_space<vmem>>, %arg4: memref<32x96xf32, #tpu.memory_space<vmem>>, %arg5: memref<16x16xf32, #tpu.memory_space<vmem>>, %arg6: memref<16x16xf32, #tpu.memory_space<vmem>>, %arg7: memref<16x16xf32, #tpu.memory_space<vmem>>, %arg8: memref<32x32xf32, #tpu.memory_space<vmem>>, %arg9: memref<1x32xf32, #tpu.memory_space<vmem>>, %arg10: memref<4x16x32xf32, #tpu.memory_space<vmem>>) attributes {dimension_semantics = [#tpu.dimension_semantics<parallel>], iteration_bounds = array<i64: 2>, scalar_prefetch = 0 : i64, scratch_operands = 0 : i64, tpu.core_type = #tpu.core_type<tc>, window_params = [{transform_indices = @transform_0, window_bounds = array<i64: 4, 16, 32>}, {pipeline_mode = #tpu.pipeline_mode<synchronous>, transform_indices = @transform_1, window_bounds = array<i64: 1, 32>}, {pipeline_mode = #tpu.pipeline_mode<synchronous>, transform_indices = @transform_2, window_bounds = array<i64: 1, 32>}, {pipeline_mode = #tpu.pipeline_mode<synchronous>, transform_indices = @transform_3, window_bounds = array<i64: 32, 96>}, {pipeline_mode = #tpu.pipeline_mode<synchronous>, transform_indices = @transform_4, window_bounds = array<i64: 16, 16>}, {pipeline_mode = #tpu.pipeline_mode<synchronous>, transform_indices = @transform_5, window_bounds = array<i64: 16, 16>}, {pipeline_mode = #tpu.pipeline_mode<synchronous>, transform_indices = @transform_6, window_bounds = array<i64: 16, 16>}, {pipeline_mode = #tpu.pipeline_mode<synchronous>, transform_indices = @transform_7, window_bounds = array<i64: 32, 32>}, {pipeline_mode = #tpu.pipeline_mode<synchronous>, transform_indices = @transform_8, window_bounds = array<i64: 1, 32>}, {transform_indices = @transform_9, window_bounds = array<i64: 4, 16, 32>}]} {
    %c0 = arith.constant 0 : index
    %c0_0 = arith.constant 0 : index
    %c0_1 = arith.constant 0 : index
    %0 = vector.load %arg1[%c0, %c0_0, %c0_1] : memref<4x16x32xf32, #tpu.memory_space<vmem>>, vector<4x16x32xf32>
    %1 = vector.shape_cast %0 : vector<4x16x32xf32> to vector<64x32xf32>
    %c0_2 = arith.constant 0 : index
    %c0_3 = arith.constant 0 : index
    %2 = vector.load %arg2[%c0_2, %c0_3] : memref<1x32xf32, #tpu.memory_space<vmem>>, vector<1x32xf32>
    %c0_4 = arith.constant 0 : index
    %c0_5 = arith.constant 0 : index
    %3 = vector.load %arg3[%c0_4, %c0_5] : memref<1x32xf32, #tpu.memory_space<vmem>>, vector<1x32xf32>
    %cst = arith.constant dense<0.000000e+00> : vector<64xf32>
    %4 = vector.multi_reduction <add>, %1, %cst [1] : vector<64x32xf32> to vector<64xf32>
    %5 = vector.shape_cast %4 : vector<64xf32> to vector<64x1xf32>
    %cst_6 = arith.constant 3.200000e+01 : f32
    %6 = vector.broadcast %cst_6 : f32 to vector<64x1xf32>
    %7 = arith.divf %5, %6 : vector<64x1xf32>
    %8 = vector.broadcast %7 : vector<64x1xf32> to vector<64x32xf32>
    %9 = arith.subf %1, %8 : vector<64x32xf32>
    %10 = arith.mulf %9, %9 : vector<64x32xf32>
    %cst_7 = arith.constant dense<0.000000e+00> : vector<64xf32>
    %11 = vector.multi_reduction <add>, %10, %cst_7 [1] : vector<64x32xf32> to vector<64xf32>
    %12 = vector.shape_cast %11 : vector<64xf32> to vector<64x1xf32>
    %cst_8 = arith.constant 3.200000e+01 : f32
    %13 = vector.broadcast %cst_8 : f32 to vector<64x1xf32>
    %14 = arith.divf %12, %13 : vector<64x1xf32>
    %15 = vector.broadcast %7 : vector<64x1xf32> to vector<64x32xf32>
    %16 = arith.subf %1, %15 : vector<64x32xf32>
    %cst_9 = arith.constant 9.99999974E-6 : f32
    %17 = vector.broadcast %cst_9 : f32 to vector<64x1xf32>
    %18 = arith.addf %14, %17 : vector<64x1xf32>
    %19 = math.rsqrt %18 : vector<64x1xf32>
    %20 = vector.broadcast %19 : vector<64x1xf32> to vector<64x32xf32>
    %21 = arith.mulf %16, %20 : vector<64x32xf32>
    %22 = vector.broadcast %2 : vector<1x32xf32> to vector<64x32xf32>
    %23 = arith.mulf %21, %22 : vector<64x32xf32>
    %24 = vector.broadcast %3 : vector<1x32xf32> to vector<64x32xf32>
    %25 = arith.addf %23, %24 : vector<64x32xf32>
    %c0_10 = arith.constant 0 : index
    %c0_11 = arith.constant 0 : index
    %26 = vector.load %arg4[%c0_10, %c0_11] : memref<32x96xf32, #tpu.memory_space<vmem>>, vector<32x96xf32>
    %cst_12 = arith.constant dense<0.000000e+00> : vector<64x96xf32>
    %27 = tpu.matmul %25, %26, %cst_12 {dimension_numbers = #tpu.dot_dimension_numbers<[1], [0], [0], [1], [0, 0, 1, 1], [], []>} : vector<64x32xf32>, vector<32x96xf32>, vector<64x96xf32> -> vector<64x96xf32>
    %28 = vector.shape_cast %27 : vector<64x96xf32> to vector<4x16x96xf32>
    %c0_13 = arith.constant 0 : index
    %c0_14 = arith.constant 0 : index
    %29 = vector.load %arg5[%c0_13, %c0_14] : memref<16x16xf32, #tpu.memory_space<vmem>>, vector<16x16xf32>
    %30 = vector.shape_cast %29 : vector<16x16xf32> to vector<1x16x16xf32>
    %c4_i32 = arith.constant 4 : i32
    %31 = arith.muli %arg0, %c4_i32 : i32
    %c4_i32_15 = arith.constant 4 : i32
    %c0_i32 = arith.constant 0 : i32
    %32 = arith.cmpi eq, %c4_i32_15, %c0_i32 : i32
    %c1_i32 = arith.constant 1 : i32
    %33 = arith.select %32, %c1_i32, %c4_i32_15 : i32
    %34 = arith.remsi %31, %33 : i32
    %c0_i32_16 = arith.constant 0 : i32
    %35 = arith.cmpi ne, %34, %c0_i32_16 : i32
    %c0_i32_17 = arith.constant 0 : i32
    %36 = arith.cmpi slt, %34, %c0_i32_17 : i32
    %c0_i32_18 = arith.constant 0 : i32
    %37 = arith.cmpi slt, %33, %c0_i32_18 : i32
    %38 = arith.xori %36, %37 : i1
    %39 = arith.andi %38, %35 : i1
    %40 = arith.addi %34, %33 : i32
    %41 = arith.select %39, %40, %34 : i32
    %42 = tpu.iota {dimensions = array<i32: 0>} : vector<4x1x1xi32>
    %43 = vector.broadcast %41 : i32 to vector<4x1x1xi32>
    %44 = arith.addi %43, %42 : vector<4x1x1xi32>
    %c2_i32 = arith.constant 2 : i32
    %45 = vector.broadcast %c2_i32 : i32 to vector<4x1x1xi32>
    %46 = arith.cmpi sge, %44, %45 : vector<4x1x1xi32>
    %c2_i32_19 = arith.constant 2 : i32
    %c0_i32_20 = arith.constant 0 : i32
    %47 = arith.cmpi eq, %c2_i32_19, %c0_i32_20 : i32
    %c1_i32_21 = arith.constant 1 : i32
    %48 = arith.select %47, %c1_i32_21, %c2_i32_19 : i32
    %49 = vector.broadcast %48 : i32 to vector<4x1x1xi32>
    %50 = arith.remsi %44, %49 : vector<4x1x1xi32>
    %c0_i32_22 = arith.constant 0 : i32
    %51 = vector.broadcast %c0_i32_22 : i32 to vector<4x1x1xi32>
    %52 = arith.cmpi ne, %50, %51 : vector<4x1x1xi32>
    %c0_i32_23 = arith.constant 0 : i32
    %53 = vector.broadcast %c0_i32_23 : i32 to vector<4x1x1xi32>
    %54 = arith.cmpi slt, %50, %53 : vector<4x1x1xi32>
    %c0_i32_24 = arith.constant 0 : i32
    %55 = arith.cmpi slt, %48, %c0_i32_24 : i32
    %56 = vector.broadcast %55 : i1 to vector<4x1x1xi1>
    %57 = vector.broadcast %56 : vector<4x1x1xi1> to vector<4x1x1xi1>
    %58 = arith.xori %54, %57 : vector<4x1x1xi1>
    %59 = arith.andi %58, %52 : vector<4x1x1xi1>
    %60 = vector.broadcast %48 : i32 to vector<4x1x1xi32>
    %61 = arith.addi %50, %60 : vector<4x1x1xi32>
    %62 = arith.select %59, %61, %50 : vector<4x1x1xi1>, vector<4x1x1xi32>
    %c1_i32_25 = arith.constant 1 : i32
    %63 = vector.broadcast %c1_i32_25 : i32 to vector<4x1x1xi32>
    %64 = arith.cmpi eq, %62, %63 : vector<4x1x1xi32>
    %c0_26 = arith.constant 0 : index
    %c0_27 = arith.constant 0 : index
    %65 = vector.load %arg6[%c0_26, %c0_27] : memref<16x16xf32, #tpu.memory_space<vmem>>, vector<16x16xf32>
    %66 = vector.shape_cast %65 : vector<16x16xf32> to vector<1x16x16xf32>
    %cst_28 = arith.constant 0.000000e+00 : f32
    %67 = vector.shape_cast %46 : vector<4x1x1xi1> to vector<4x1x1xi1>
    %68 = vector.broadcast %67 : vector<4x1x1xi1> to vector<4x16x16xi1>
    %69 = vector.shape_cast %66 : vector<1x16x16xf32> to vector<1x16x16xf32>
    %70 = vector.broadcast %69 : vector<1x16x16xf32> to vector<4x16x16xf32>
    %71 = vector.broadcast %cst_28 : f32 to vector<4x16x16xf32>
    %72 = arith.select %68, %70, %71 : vector<4x16x16xi1>, vector<4x16x16xf32>
    %73 = vector.broadcast %30 : vector<1x16x16xf32> to vector<4x16x16xf32>
    %74 = arith.addf %73, %72 : vector<4x16x16xf32>
    %c0_29 = arith.constant 0 : index
    %c0_30 = arith.constant 0 : index
    %75 = vector.load %arg7[%c0_29, %c0_30] : memref<16x16xf32, #tpu.memory_space<vmem>>, vector<16x16xf32>
    %76 = vector.shape_cast %75 : vector<16x16xf32> to vector<1x16x16xf32>
    %cst_31 = arith.constant 0.000000e+00 : f32
    %77 = vector.shape_cast %64 : vector<4x1x1xi1> to vector<4x1x1xi1>
    %78 = vector.broadcast %77 : vector<4x1x1xi1> to vector<4x16x16xi1>
    %79 = vector.shape_cast %76 : vector<1x16x16xf32> to vector<1x16x16xf32>
    %80 = vector.broadcast %79 : vector<1x16x16xf32> to vector<4x16x16xf32>
    %81 = vector.broadcast %cst_31 : f32 to vector<4x16x16xf32>
    %82 = arith.select %78, %80, %81 : vector<4x16x16xi1>, vector<4x16x16xf32>
    %83 = arith.addf %74, %82 : vector<4x16x16xf32>
    %84 = vector.extract_strided_slice %28 {offsets = [0, 0, 0], sizes = [4, 16, 16], strides = [1, 1, 1]} : vector<4x16x96xf32> to vector<4x16x16xf32>
    %85 = vector.extract_strided_slice %28 {offsets = [0, 0, 32], sizes = [4, 16, 16], strides = [1, 1, 1]} : vector<4x16x96xf32> to vector<4x16x16xf32>
    %86 = vector.extract_strided_slice %28 {offsets = [0, 0, 64], sizes = [4, 16, 16], strides = [1, 1, 1]} : vector<4x16x96xf32> to vector<4x16x16xf32>
    "tpu.trace_start"() <{level = 10 : i32, message = "wid,wjd->wij"}> : () -> ()
    %cst_32 = arith.constant dense<0.000000e+00> : vector<4x16x16xf32>
    %87 = tpu.matmul %84, %85, %cst_32 {dimension_numbers = #tpu.dot_dimension_numbers<[2], [2], [1], [1], [0, 0, 0, 1, 1, 1], [0], [0]>} : vector<4x16x16xf32>, vector<4x16x16xf32>, vector<4x16x16xf32> -> vector<4x16x16xf32>
    "tpu.trace_stop"() : () -> ()
    %cst_33 = arith.constant 2.500000e-01 : f32
    %88 = vector.broadcast %cst_33 : f32 to vector<4x16x16xf32>
    %89 = arith.mulf %87, %88 : vector<4x16x16xf32>
    %90 = arith.addf %89, %83 : vector<4x16x16xf32>
    %cst_34 = arith.constant dense<0xFF800000> : vector<4x16xf32>
    %91 = vector.multi_reduction <maximumf>, %90, %cst_34 [2] : vector<4x16x16xf32> to vector<4x16xf32>
    %92 = vector.shape_cast %91 : vector<4x16xf32> to vector<4x16x1xf32>
    %93 = vector.broadcast %92 : vector<4x16x1xf32> to vector<4x16x16xf32>
    %94 = arith.subf %90, %93 : vector<4x16x16xf32>
    %95 = math.exp %94 : vector<4x16x16xf32>
    %cst_35 = arith.constant dense<0.000000e+00> : vector<4x16xf32>
    %96 = vector.multi_reduction <add>, %95, %cst_35 [2] : vector<4x16x16xf32> to vector<4x16xf32>
    %97 = vector.shape_cast %96 : vector<4x16xf32> to vector<4x16x1xf32>
    %98 = vector.broadcast %97 : vector<4x16x1xf32> to vector<4x16x16xf32>
    %99 = arith.divf %95, %98 : vector<4x16x16xf32>
    "tpu.trace_start"() <{level = 10 : i32, message = "wij,wjd->wid"}> : () -> ()
    %cst_36 = arith.constant dense<0.000000e+00> : vector<4x16x16xf32>
    %100 = tpu.matmul %99, %86, %cst_36 {dimension_numbers = #tpu.dot_dimension_numbers<[2], [1], [1], [2], [0, 0, 0, 1, 1, 2], [0], [0]>} : vector<4x16x16xf32>, vector<4x16x16xf32>, vector<4x16x16xf32> -> vector<4x16x16xf32>
    "tpu.trace_stop"() : () -> ()
    %101 = vector.extract_strided_slice %28 {offsets = [0, 0, 16], sizes = [4, 16, 16], strides = [1, 1, 1]} : vector<4x16x96xf32> to vector<4x16x16xf32>
    %102 = vector.extract_strided_slice %28 {offsets = [0, 0, 48], sizes = [4, 16, 16], strides = [1, 1, 1]} : vector<4x16x96xf32> to vector<4x16x16xf32>
    %103 = vector.extract_strided_slice %28 {offsets = [0, 0, 80], sizes = [4, 16, 16], strides = [1, 1, 1]} : vector<4x16x96xf32> to vector<4x16x16xf32>
    "tpu.trace_start"() <{level = 10 : i32, message = "wid,wjd->wij"}> : () -> ()
    %cst_37 = arith.constant dense<0.000000e+00> : vector<4x16x16xf32>
    %104 = tpu.matmul %101, %102, %cst_37 {dimension_numbers = #tpu.dot_dimension_numbers<[2], [2], [1], [1], [0, 0, 0, 1, 1, 1], [0], [0]>} : vector<4x16x16xf32>, vector<4x16x16xf32>, vector<4x16x16xf32> -> vector<4x16x16xf32>
    "tpu.trace_stop"() : () -> ()
    %cst_38 = arith.constant 2.500000e-01 : f32
    %105 = vector.broadcast %cst_38 : f32 to vector<4x16x16xf32>
    %106 = arith.mulf %104, %105 : vector<4x16x16xf32>
    %107 = arith.addf %106, %83 : vector<4x16x16xf32>
    %cst_39 = arith.constant dense<0xFF800000> : vector<4x16xf32>
    %108 = vector.multi_reduction <maximumf>, %107, %cst_39 [2] : vector<4x16x16xf32> to vector<4x16xf32>
    %109 = vector.shape_cast %108 : vector<4x16xf32> to vector<4x16x1xf32>
    %110 = vector.broadcast %109 : vector<4x16x1xf32> to vector<4x16x16xf32>
    %111 = arith.subf %107, %110 : vector<4x16x16xf32>
    %112 = math.exp %111 : vector<4x16x16xf32>
    %cst_40 = arith.constant dense<0.000000e+00> : vector<4x16xf32>
    %113 = vector.multi_reduction <add>, %112, %cst_40 [2] : vector<4x16x16xf32> to vector<4x16xf32>
    %114 = vector.shape_cast %113 : vector<4x16xf32> to vector<4x16x1xf32>
    %115 = vector.broadcast %114 : vector<4x16x1xf32> to vector<4x16x16xf32>
    %116 = arith.divf %112, %115 : vector<4x16x16xf32>
    "tpu.trace_start"() <{level = 10 : i32, message = "wij,wjd->wid"}> : () -> ()
    %cst_41 = arith.constant dense<0.000000e+00> : vector<4x16x16xf32>
    %117 = tpu.matmul %116, %103, %cst_41 {dimension_numbers = #tpu.dot_dimension_numbers<[2], [1], [1], [2], [0, 0, 0, 1, 1, 2], [0], [0]>} : vector<4x16x16xf32>, vector<4x16x16xf32>, vector<4x16x16xf32> -> vector<4x16x16xf32>
    "tpu.trace_stop"() : () -> ()
    %118 = tpu.concatenate %100, %117 in 2 : vector<4x16x16xf32>, vector<4x16x16xf32> -> vector<4x16x32xf32>
    %119 = vector.shape_cast %118 : vector<4x16x32xf32> to vector<64x32xf32>
    %c0_42 = arith.constant 0 : index
    %c0_43 = arith.constant 0 : index
    %120 = vector.load %arg8[%c0_42, %c0_43] : memref<32x32xf32, #tpu.memory_space<vmem>>, vector<32x32xf32>
    %cst_44 = arith.constant dense<0.000000e+00> : vector<64x32xf32>
    %121 = tpu.matmul %119, %120, %cst_44 {dimension_numbers = #tpu.dot_dimension_numbers<[1], [0], [0], [1], [0, 0, 1, 1], [], []>} : vector<64x32xf32>, vector<32x32xf32>, vector<64x32xf32> -> vector<64x32xf32>
    %c0_45 = arith.constant 0 : index
    %c0_46 = arith.constant 0 : index
    %122 = vector.load %arg9[%c0_45, %c0_46] : memref<1x32xf32, #tpu.memory_space<vmem>>, vector<1x32xf32>
    %123 = vector.broadcast %122 : vector<1x32xf32> to vector<64x32xf32>
    %124 = arith.addf %121, %123 : vector<64x32xf32>
    %125 = arith.addf %124, %1 : vector<64x32xf32>
    %126 = vector.shape_cast %125 : vector<64x32xf32> to vector<4x16x32xf32>
    %c0_47 = arith.constant 0 : index
    %c0_48 = arith.constant 0 : index
    %c0_49 = arith.constant 0 : index
    %127 = vector.load %arg10[%c0_47, %c0_48, %c0_49] : memref<4x16x32xf32, #tpu.memory_space<vmem>>, vector<4x16x32xf32>
    tpu.vector_store %arg10[%c0_47, %c0_48, %c0_49], %126 {strides = array<i32>} : memref<4x16x32xf32, #tpu.memory_space<vmem>>, vector<4x16x32xf32>,
    return
  }
  func.func @transform_0(%arg0: i32) -> (i32, i32, i32) {
    %c0_i32 = arith.constant 0 : i32
    %c0_i32_0 = arith.constant 0 : i32
    %c0_i32_1 = arith.constant 0 : i32
    return %arg0, %c0_i32, %c0_i32_0 : i32, i32, i32
  }
  func.func @transform_1(%arg0: i32) -> (i32, i32) {
    %c0_i32 = arith.constant 0 : i32
    %c0_i32_0 = arith.constant 0 : i32
    %c0_i32_1 = arith.constant 0 : i32
    return %c0_i32, %c0_i32_0 : i32, i32
  }
  func.func @transform_2(%arg0: i32) -> (i32, i32) {
    %c0_i32 = arith.constant 0 : i32
    %c0_i32_0 = arith.constant 0 : i32
    %c0_i32_1 = arith.constant 0 : i32
    return %c0_i32, %c0_i32_0 : i32, i32
  }
  func.func @transform_3(%arg0: i32) -> (i32, i32) {
    %c0_i32 = arith.constant 0 : i32
    %c0_i32_0 = arith.constant 0 : i32
    %c0_i32_1 = arith.constant 0 : i32
    return %c0_i32, %c0_i32_0 : i32, i32
  }
  func.func @transform_4(%arg0: i32) -> (i32, i32) {
    %c0_i32 = arith.constant 0 : i32
    %c0_i32_0 = arith.constant 0 : i32
    %c0_i32_1 = arith.constant 0 : i32
    return %c0_i32, %c0_i32_0 : i32, i32
  }
  func.func @transform_5(%arg0: i32) -> (i32, i32) {
    %c0_i32 = arith.constant 0 : i32
    %c0_i32_0 = arith.constant 0 : i32
    %c0_i32_1 = arith.constant 0 : i32
    return %c0_i32, %c0_i32_0 : i32, i32
  }
  func.func @transform_6(%arg0: i32) -> (i32, i32) {
    %c0_i32 = arith.constant 0 : i32
    %c0_i32_0 = arith.constant 0 : i32
    %c0_i32_1 = arith.constant 0 : i32
    return %c0_i32, %c0_i32_0 : i32, i32
  }
  func.func @transform_7(%arg0: i32) -> (i32, i32) {
    %c0_i32 = arith.constant 0 : i32
    %c0_i32_0 = arith.constant 0 : i32
    %c0_i32_1 = arith.constant 0 : i32
    return %c0_i32, %c0_i32_0 : i32, i32
  }
  func.func @transform_8(%arg0: i32) -> (i32, i32) {
    %c0_i32 = arith.constant 0 : i32
    %c0_i32_0 = arith.constant 0 : i32
    %c0_i32_1 = arith.constant 0 : i32
    return %c0_i32, %c0_i32_0 : i32, i32
  }
  func.func @transform_9(%arg0: i32) -> (i32, i32, i32) {
    %c0_i32 = arith.constant 0 : i32
    %c0_i32_0 = arith.constant 0 : i32
    %c0_i32_1 = arith.constant 0 : i32
    return %arg0, %c0_i32, %c0_i32_0 : i32, i32, i32
  }
}

</mosaic_0001>

<bundles_post_ra>
// kernel: tpu_custom_call.1
= control target key start
LH: loop header
LB: loop body
LE: loop exit
PB: predicated region body
PF: predicated region fallthrough
CT: control target
= control target key end

     0   :  { %s4440_s0 = inlined_call_operand.hbm [shape: f32[8,16,32], index: 0, kind: input, shape index: {}]   ;;  %s4441_s1 = inlined_call_operand.vmem [shape: f32[1,32], index: 1, kind: input, shape index: {}]   ;;  %s4442_s2 = inlined_call_operand.vmem [shape: f32[1,32], index: 2, kind: input, shape index: {}]   ;;  %s4443_s3 = inlined_call_operand.hbm [shape: f32[32,96], index: 3, kind: input, shape index: {}]   ;;  %s4444_s4 = inlined_call_operand.hbm [shape: f32[16,16], index: 4, kind: input, shape index: {}]   ;;  %s4445_s5 = inlined_call_operand.hbm [shape: f32[16,16], index: 5, kind: input, shape index: {}]   ;;  %s4446_s6 = inlined_call_operand.hbm [shape: f32[16,16], index: 6, kind: input, shape index: {}]   ;;  %s4447_s7 = inlined_call_operand.hbm [shape: f32[32,32], index: 7, kind: input, shape index: {}]   ;;  %s4448_s8 = inlined_call_operand.vmem [shape: f32[1,32], index: 8, kind: input, shape index: {}]   ;;  %s4449_s9 = inlined_call_operand.hbm [shape: f32[8,16,32], index: 9, kind: output, shape index: {}]  }
   0x1   :  { %4456 = sst [smem:[#allocation19_spill]] %s4443_s3 }
   0x2   :  { %4457 = sst [smem:[#allocation20_spill]] %s4444_s4 }
   0x3   :  { %4458 = sst [smem:[#allocation21_spill]] %s4445_s5 }
   0x4   :  { %14 = vsyncpa [#allocation3], 0 }
   0x5   :  { %16 = vsyncpa [#allocation3 + $0x1], 0 }
   0x6   :  { %17 = vsyncpa [#allocation6], 0 }
   0x7   :  { %18 = vsyncpa [#allocation9], 0 }
   0x8   :  { %19 = vsyncpa [#allocation12], 0 }
   0x9   :  { %20 = vsyncpa [#allocation4], 0 }
   0xa   :  { %22 = vsyncpa [#allocation4 + $0x1], 0  ;;  %s3639_s30 = smov 0   ;;  %s3641_s10 = smov 0  }
   0xb   :  { %s3643_s11 = smov 0   ;;  %s3645_s12 = smov 0  }
   0xc LB: > { %s3572_s13 = smov [#allocation5]   ;;  %s3660_s15 = sadd.s32 4294967295, %s3570_s12   ;;  %s3570_s12 = sphi %s3645_s12, %s4499_s12   ;;  %s3566_s11 = sphi %s3643_s11, %s4498_s11   ;;  %s3562_s10 = sphi %s3641_s10, %s4497_s10   ;;  %s3558_s30 = sphi %s3639_s30, %s4496_s30  }
   0xd   : > { %s271_s14 = sshll.u32 %s3572_s13, 4  ;;  %p2789_p0 = scmp.ge.s32.totalorder %s3570_s12, 1  ;;  %s272_s14 = int_to_ptr.vmem [resolvable:$true] %s271_s14 }
   0xe   : > { %p4452_p1 = scmp.eq.s32.totalorder %s3660_s15, 0  ;;  %p253_p2 = scmp.lt.s32.totalorder %s3570_s12, 3 }
   0xf   : > { %s3573_s17 = smov [#allocation8]   ;;  %s3574_s20 = smov [#allocation7]  }
  0x10   : > { %p3665_p3 = pnand %p2789_p0, %p253_p2  ;;  %s297_s18 = sshll.u32 %s3573_s17, 4  ;;  %s3678_s18 = int_to_ptr.vmem [resolvable:$true] %s297_s18 }
  0x11   : > { %s284_s21 = sshll.u32 %s3574_s20, 4  ;;  %s3347_s23 = scalar_lea.vmem %s272_s14, 512  ;;  %s3680_s21 = int_to_ptr.vmem [resolvable:$true] %s284_s21 }
  0x12   : > { %s4459_s16 = scalar_select %p3665_p3, 1, 0 }
  0x13   : > { %p3165_p5 = pneg %p3665_p3  ;;  %p3348_p8 = scmp.ne.s32.totalorder %s272_s14, %s3347_s23 }
  0x14   : > { %p3355_p11 = scmp.lt.s32.totalorder %s272_s14, %s272_s14  ;;  %p3356_p12 = scmp.lt.s32.totalorder %s3347_s23, %s3347_s23 }
  0x15   : > { %p3674_p6 = pnand %p3165_p5, %p4452_p1 }
  0x16   : > { %p3357_p13 = por %p3356_p12, %p3355_p11 }
  0x17   : > { %p3684_p7 = pneg %p3674_p6 }
  0x19   : > { %p3350_p9 = pnand %p3348_p8, %p3684_p7 }
  0x1b   : > { %p3351_p10 = pneg %p3350_p9 }
  0x1d   : > { %p3358_p0 = pnand %p3357_p13, %p3351_p10 }
  0x1f   : > { %3361 = shalt.err (!%p3358_p0)
}
  0x20   : > { %s4450_s24 = smov 128   ;;  %s4451_s25 = smov 8  }
  0x21   : > { %s4462_s3 = sld [smem:[#allocation19_spill]]  ;;  %s3373_s28 = scalar_lea.vmem %s3678_s18, 256 }
  0x22   : > { %p3374_p2 = scmp.ne.s32.totalorder %s3678_s18, %s3373_s28  ;;  %p3381_p9 = scmp.lt.s32.totalorder %s3678_s18, %s3678_s18 }
  0x23   : > { %p3382_p10 = scmp.lt.s32.totalorder %s3373_s28, %s3373_s28 }
  0x24   : > { %p3376_p5 = pnand %p3374_p2, %p3684_p7 }
  0x25   : > { %p3383_p11 = por %p3382_p10, %p3381_p9 }
  0x26   : > { %p3377_p8 = pneg %p3376_p5 }
  0x27   : > { %3168 = dma.hbm_to_vmem [thread:$0]  (!%p3674_p6), %s4462_s3, 512, %s272_s14, [#allocation6], %s4450_s24, %s4450_s24, %s4451_s25  }
  0x28   : > { %p3384_p12 = pnand %p3383_p11, %p3377_p8 }
  0x2a   : > { %3387 = shalt.err (!%p3384_p12)
}
  0x2b   : > { %s4463_s5 = sld [smem:[#allocation21_spill]]  ;;  %s3399_s14 = scalar_lea.vmem %s3680_s21, 256 }
  0x2c   : > { %p3400_p13 = scmp.ne.s32.totalorder %s3680_s21, %s3399_s14  ;;  %p3407_p5 = scmp.lt.s32.totalorder %s3680_s21, %s3680_s21 }
  0x2d   : > { %p3408_p8 = scmp.lt.s32.totalorder %s3399_s14, %s3399_s14 }
  0x2e   : > { %p3402_p0 = pnand %p3400_p13, %p3684_p7 }
  0x2f   : > { %p3409_p9 = por %p3408_p8, %p3407_p5 }
  0x30   : > { %p3403_p2 = pneg %p3402_p0 }
  0x31   : > { %3174 = dma.hbm_to_vmem [thread:$0]  (!%p3674_p6), %s4463_s5, 256, %s3678_s18, [#allocation9], %s4450_s24, %s4450_s24, %s4451_s25  }
  0x32   : > { %p3410_p10 = pnand %p3409_p9, %p3403_p2 }
  0x34   : > { %3413 = shalt.err (!%p3410_p10)
}
  0x35   : > { %s4464_s4 = sld [smem:[#allocation20_spill]]  ;;  %s3577_s18 = smov [#allocation10]  }
  0x36   : > { %s310_s23 = sshll.u32 %s3577_s18, 4  ;;  %s3578_s26 = smov [#allocation11]   ;;  %s311_s23 = int_to_ptr.vmem [resolvable:$true] %s310_s23 }
  0x37   : > { %s323_s27 = sshll.u32 %s3578_s26, 4  ;;  %s3425_s28 = scalar_lea.vmem %s311_s23, 256  ;;  %s324_s27 = int_to_ptr.vmem [resolvable:$true] %s323_s27 }
  0x38   : > { %p3426_p11 = scmp.ne.s32.totalorder %s311_s23, %s3425_s28  ;;  %p3433_p0 = scmp.lt.s32.totalorder %s311_s23, %s311_s23 }
  0x39   : > { %p3434_p2 = scmp.lt.s32.totalorder %s3425_s28, %s3425_s28 }
  0x3a   : > { %p3428_p12 = pnand %p3426_p11, %p3684_p7 }
  0x3b   : > { %3171 = dma.hbm_to_vmem [thread:$0]  (!%p3674_p6), %s4464_s4, 256, %s3680_s21, [#allocation6], %s4450_s24, %s4450_s24, %s4451_s25  }
  0x3c   : > { %p3429_p13 = pneg %p3428_p12  ;;  %p3435_p5 = por %p3434_p2, %p3433_p0 }
  0x3e   : > { %p3436_p8 = pnand %p3435_p5, %p3429_p13 }
  0x40   : > { %3439 = shalt.err (!%p3436_p8)
}
  0x41   : > { %3177 = dma.hbm_to_vmem [thread:$0]  (!%p3674_p6), %s4446_s6, 256, %s311_s23, [#allocation9], %s4450_s24, %s4450_s24, %s4451_s25  }
  0x42   : > { %s3451_s13 = scalar_lea.vmem %s324_s27, 512  ;;  %p3459_p12 = scmp.lt.s32.totalorder %s324_s27, %s324_s27 }
  0x43   : > { %p3452_p9 = scmp.ne.s32.totalorder %s324_s27, %s3451_s13  ;;  %p3460_p0 = scmp.lt.s32.totalorder %s3451_s13, %s3451_s13 }
  0x45   : > { %p3454_p10 = pnand %p3452_p9, %p3684_p7  ;;  %p3461_p13 = por %p3460_p0, %p3459_p12 }
  0x47   : > { %p3455_p11 = pneg %p3454_p10 }
  0x49   : > { %p3462_p2 = pnand %p3461_p13, %p3455_p11 }
  0x4b   : > { %3465 = shalt.err (!%p3462_p2)
}
  0x4c   : > { %3180 = dma.hbm_to_vmem [thread:$0]  (!%p3674_p6), %s4447_s7, 512, %s324_s27, [#allocation12], %s4450_s24, %s4450_s24, %s4451_s25  }
  0x4d   : > { %s2788_s19 = sadd.s32 4294967294, %s3570_s12   ;;  %s3750_s22 = sadd.s32 1, %s3570_s12  }
  0x4e   : > { %s35_s20 = sadd.s32 1, %s3566_s11  ;;  %s32_s18 = ssub.s32 %s3570_s12, %s3750_s22 }
  0x4f   : > { %p42_p7 = scmp.ne.s32.totalorder %s3566_s11, %s3562_s10  ;;  %p33_p5 = scmp.eq.s32.totalorder %s32_s18, 0 }
  0x50   : > { %p43_p8 = scmp.eq.s32.totalorder %s3570_s12, 0  ;;  %p48_p9 = scmp.ne.s32.totalorder %s3562_s10, %s3558_s30 }
  0x51   : > { %p240_p10 = scmp.eq.s32.totalorder %s3660_s15, 1  ;;  %p246_p0 = scmp.eq.s32.totalorder %s2788_s19, 1 }
  0x52   : > { %s3762_s23 = scalar_select %p33_p5, %s3566_s11, %s35_s20  }
  0x53   : > { %p44_p11 = por %p43_p8, %p42_p7  ;;  %p3766_p12 = por %p4452_p1, %p48_p9 }
  0x54   : > { %p3770_p6 = por %p240_p10, %p42_p7  ;;  %p3194_p13 = scmp.lt.s32.totalorder %s3570_s12, 2 }
  0x55   : > { %s4465_s26 = scalar_select %p3766_p12, 1, 0 }
  0x56   : > { %s4466_s27 = scalar_select %p3770_p6, 1, 0 }
  0x57   : > { %s340_s28 = sand.u32 1, %s3566_s11   ;;  %p3776_p2 = por %p246_p0, %p48_p9 }
  0x58   : > { %s2796_s29 = sshll.u32 %s340_s28, 6  ;;  %s2890_s13 = sshll.u32 %s3570_s12, 10 }
  0x59   : > { %s4467_s21 = scalar_select %p3776_p2, 1, 0 }
  0x5a   : > { %s3784_s20 = scalar_lea.hbm %s4440_s0, %s2890_s13  ;;  %s344_s18 = scalar_lea.vmem [#allocation2], %s2796_s29 }
  0x5b   : > { %s352_s24 = sshll.u32 %s344_s18, 4  ;;  %p3786_p7 = pnand %p3194_p13, %p44_p11  ;;  %s3790_s24 = int_to_ptr.vmem [resolvable:$true] %s352_s24 }
  0x5c   : > { %s3792_s25 = scalar_lea.sflag [#allocation3], %s340_s28  ;;  %s3466_s3 = scalar_lea.hbm %s3784_s20, 1024 }
  0x5d   : > { %p3467_p5 = scmp.ne.s32.totalorder %s3784_s20, %s3466_s3  ;;  %p3468_p8 = pneg %p3786_p7 }
  0x5e   : > { %s3471_s29 = scalar_lea.hbm %s4440_s0, 2048  ;;  %p3472_p11 = scmp.lt.s32.totalorder %s3784_s20, %s4440_s0 }
  0x5f   : > { %p3469_p9 = pnand %p3468_p8, %p3467_p5  ;;  %p3473_p0 = scmp.lt.s32.totalorder %s3471_s29, %s3466_s3 }
  0x61   : > { %p3470_p10 = pneg %p3469_p9  ;;  %p3474_p13 = por %p3473_p0, %p3472_p11 }
  0x63   : > { %p3475_p4 = pnand %p3474_p13, %p3470_p10 }
  0x65   : > { %3478 = shalt.err (!%p3475_p4)
}
  0x66   : > { %s3479_s28 = scalar_lea.vmem %s3790_s24, 1024  ;;  %s3579_s4 = smov [#allocation2]  }
  0x67   : > { %p3480_p1 = scmp.ne.s32.totalorder %s3790_s24, %s3479_s28  ;;  %s3484_s5 = sshll.u32 %s3579_s4, 4  ;;  %s3485_s5 = int_to_ptr.vmem [resolvable:$false] %s3484_s5 }
  0x68   : > { %s3486_s13 = scalar_lea.vmem %s3485_s5, 2048  ;;  %p3487_p9 = scmp.lt.s32.totalorder %s3790_s24, %s3485_s5 }
  0x69   : > { %p3482_p2 = pnand %p3480_p1, %p3468_p8  ;;  %p3488_p6 = scmp.lt.s32.totalorder %s3486_s13, %s3479_s28 }
  0x6b   : > { %p3483_p5 = pneg %p3482_p2  ;;  %p3489_p12 = por %p3488_p6, %p3487_p9 }
  0x6d   : > { %p3490_p3 = pnand %p3489_p12, %p3483_p5 }
  0x6f   : > { %3493 = shalt.err (!%p3490_p3)
}
  0x70   : > { %s4469_s3 = smov 8   ;;  %s4470_s14 = smov 128  }
  0x71   : > { %3184 = dma.hbm_to_vmem [thread:$0]  (!%p3786_p7), %s3784_s20, 1024, %s3790_s24, %s3792_s25, %s4470_s14, %s4470_s14, %s4469_s3  }
  0x72   : > { %p4471_p1 = scmp.ne.s32.totalorder %s4459_s16, 0 }
  0x73   : > { %s3819_s4 = sand.u32 (!%p4471_p1), 1, %s3562_s10   ;;  %p4472_p3 = scmp.ne.s32.totalorder (!%p4471_p1), %s4465_s26, 0 }
  0x74   : > { %364 = sbr.rel (%p4471_p1) target bundleno = 2362 (0x93a), region = 56  ;;  %s2801_s5 = sshll.u32 (!%p4471_p1), %s3819_s4, 6 }
  0x75   : > { %s367_s29 = scalar_lea.sflag (!%p4471_p1), [#allocation3], %s3819_s4  ;;  %s3825_s19 = scalar_lea.vmem (!%p4471_p1), [#allocation2], %s2801_s5 }
  0x79   : > { %3537 = dma.done.wait (%p4472_p3), %s367_s29, 1024  }
  0x7a   : > { %3539 = vsyncadd (%p4472_p3), %s367_s29, 4294966272  ;;  %p4473_p4 = scmp.eq.s32.totalorder %s3660_s15, 0 }
  0x7c   : > { %3541 = dma.done.wait (%p4473_p4), [#allocation6], 768   ;;  %p4474_p12 = pmov %p4473_p4 }
  0x7d   : > { %p4475_p6 = pmov %p4473_p4 }
  0x7e   : > { %3543 = vsyncadd (%p4474_p12), [#allocation6], 4294966528 }
  0x7f   : > { %3545 = dma.done.wait (%p4475_p6), [#allocation9], 512   ;;  %p4476_p2 = pmov %p4473_p4 }
  0x81   : > { %3547 = vsyncadd (%p4476_p2), [#allocation9], 4294966784  ;;  %p4477_p7 = pmov %p4476_p2 }
  0x82   : > { %p4478_p8 = pmov %p4476_p2 }
  0x83   : > { %3549 = dma.done.wait (%p4477_p7), [#allocation12], 512  }
  0x84   : > { %3551 = vsyncadd (%p4478_p8), [#allocation12], 4294966784  ;;  %vm437_vm0 = vcmask 261120   ;;  %v427_v0 = vld [vmem:[%s3825_s19] sm:$0xff]  ;;  %v429_v1 = vld [vmem:[%s3825_s19 + $0x10] sm:$0xff]  ;;  %vm837_vm1 = vcmask 130048  }
  0x85   : > { %v428_v2 = vld [vmem:[%s3825_s19 + $0x8] sm:$0xff]  ;;  %v438_v3 = vsel %vm437_vm0, %v427_v0, 0.0  ;;  %v444_v4 = vsel %vm437_vm0, %v429_v1, 0.0  ;;  %v430_v5 = vld [vmem:[%s3825_s19 + $0x18] sm:$0xff]  ;;  %v431_v8 = vld [vmem:[%s3825_s19 + $0x20] sm:$0xff]  ;;  %s3580_s20 = smov 96  }
  0x86   : > { %439 = vadd.xlane.f32.xlu0 %v438_v3  ;;  %445 = vadd.xlane.f32.xlu1 %v444_v4  ;;  %v441_v6 = vsel %vm437_vm0, %v428_v2, 0.0  ;;  %v447_v7 = vsel %vm437_vm0, %v430_v5, 0.0  ;;  %v432_v9 = vld [vmem:[%s3825_s19 + $0x28] sm:$0xff]  ;;  %v450_v10 = vsel %vm437_vm0, %v431_v8, 0.0  ;;  %v433_v12 = vld [vmem:[%s3825_s19 + $0x30] sm:$0xff]  ;;  %v434_v13 = vld [vmem:[%s3825_s19 + $0x38] sm:$0xff] }
  0x87   : > { %v453_v11 = vsel %vm437_vm0, %v432_v9, 0.0  ;;  %v456_v14 = vsel %vm437_vm0, %v433_v12, 0.0  ;;  %v459_v15 = vsel %vm437_vm0, %v434_v13, 0.0  ;;  %v574_v56 = vld [vmem:[#allocation5 + $0x18] sm:$0xff]  ;;  %v573_v57 = vld [vmem:[#allocation5 + $0x10] sm:$0xff]  ;;  %v572_v58 = vld [vmem:[#allocation5 + $0x8] sm:$0xff] }
  0x88   : > { %2981 = vmatprep.subr.mxu0 %v574_v56  ;;  %3133 = vmatprep.subr.mxu1 %v574_v56  ;;  %v571_v59 = vld [vmem:[#allocation5] sm:$0xff]  ;;  %s2818_s17 = sshll.u32 %s3660_s15, 2  ;;  %s3581_s29 = smov 64  }
  0x89   : > { %2982 = vmatpush3.msra.mxu0 %v574_v56  ;;  %3137 = vmatpush3.msra.mxu1 %v574_v56  ;;  %s708_s18 = ssub.s32 0, %s2818_s17  ;;  %p707_p10 = scmp.lt.s32.totalorder %s2818_s17, 0 }
  0x8a   : > { %442 = vadd.xlane.f32.xlu0 %v441_v6  ;;  %448 = vadd.xlane.f32.xlu1 %v447_v7  ;;  %s2819_s28 = smin.u32 %s2818_s17, %s708_s18  ;;  %s3582_s16 = smov 80  }
  0x8b   : > { %2983 = vmatprep.subr.mxu0 %v573_v57  ;;  %3134 = vmatprep.subr.mxu1 %v573_v57  ;;  %s710_s13 = sand.u32 3, %s2819_s28   ;;  %s3583_s24 = smov 112  }
  0x8c   : > { %2984 = vmatpush3.msra.mxu0 %v573_v57  ;;  %3138 = vmatpush3.msra.mxu1 %v573_v57  ;;  %s711_s3 = ssub.s32 0, %s710_s13  ;;  %s3584_s25 = smov 48  }
  0x8d   : > { %2985 = vmatprep.subr.mxu0 %v572_v58  ;;  %3135 = vmatprep.subr.mxu1 %v572_v58  ;;  %s4501_s3 = smov (!%p707_p10, %s711_s3), %s710_s13  ;;  %s3585_s26 = smov 16  }
  0x8e   : > { %451 = vadd.xlane.f32.xlu0 %v450_v10  ;;  %454 = vadd.xlane.f32.xlu1 %v453_v11  ;;  %p2821_p11 = scmp.lt.s32.totalorder %s4501_s3, 0  ;;  %s717_s14 = sadd.s32 4, %s4501_s3 }
  0x8f   : > { %2986 = vmatpush3.msra.mxu0 %v572_v58  ;;  %3139 = vmatpush3.msra.mxu1 %v572_v58  ;;  %s4365_s18 = scalar_lea.vmem [#allocation13], %s2801_s5  ;;  %s2892_s5 = sshll.u32 %s3660_s15, 10 }
  0x90   : > { %2987 = vmatprep.subr.mxu0 %v571_v59  ;;  %3136 = vmatprep.subr.mxu1 %v571_v59  ;;  %s4503_s14 = smov (!%p2821_p11, %s717_s14), %s4501_s3  ;;  %s2667_s28 = sshll.u32 %s4365_s18, 4  ;;  %s4392_s28 = int_to_ptr.vmem [resolvable:$true] %s2667_s28 }
  0x91   : > { %2988 = vmatpush3.msra.mxu0 %v571_v59  ;;  %3140 = vmatpush3.msra.mxu1 %v571_v59  ;;  %s2653_s15 = scalar_lea.sflag [#allocation4], %s3819_s4  ;;  %p4493_p13 = scmp.ne.s32.totalorder %s4466_s27, 0 }
  0x92   : > { %457 = vadd.xlane.f32.xlu0 %v456_v14  ;;  %460 = vadd.xlane.f32.xlu1 %v459_v15 }
 0x10f   : > { %v440_v16 = vpop.xlane.xlu0 %439  ;;  %v446_v17 = vpop.xlane.xlu1 %445 }
 0x110   : > { %v463_v18 = vmul.f32 0.03125, %v440_v16  ;;  %v465_v19 = vmul.f32 0.03125, %v446_v17 }
 0x112   : > { %v3859_v20 = vsub.f32 %v427_v0, %v463_v18  ;;  %v3861_v21 = vsub.f32 %v429_v1, %v465_v19 }
 0x113   : > { %v443_v22 = vpop.xlane.xlu0 %442  ;;  %v449_v23 = vpop.xlane.xlu1 %448 }
 0x114   : > { %v464_v24 = vmul.f32 0.03125, %v443_v22  ;;  %v466_v25 = vmul.f32 0.03125, %v449_v23  ;;  %v479_v26 = vmul.f32 %v3859_v20, %v3859_v20  ;;  %v481_v27 = vmul.f32 %v3861_v21, %v3861_v21  ;;  %v2808_v22 = vld [vmem:[%s4441_s1] ss:$0 sm:$0xff] }
 0x116   : > { %v3867_v28 = vsub.f32 %v428_v2, %v464_v24  ;;  %v3869_v29 = vsub.f32 %v430_v5, %v466_v25  ;;  %v487_v30 = vsel %vm437_vm0, %v479_v26, 0.0  ;;  %v493_v33 = vsel %vm437_vm0, %v481_v27, 0.0  ;;  %v2809_v25 = vld [vmem:[%s4442_s2] ss:$0 sm:$0xff] }
 0x117   : > { %488 = vadd.xlane.f32.xlu0 %v487_v30  ;;  %v452_v31 = vpop.xlane.xlu0 %451  ;;  %v455_v32 = vpop.xlane.xlu1 %454 }
 0x118   : > { %v467_v34 = vmul.f32 0.03125, %v452_v31  ;;  %v468_v35 = vmul.f32 0.03125, %v455_v32  ;;  %v480_v36 = vmul.f32 %v3867_v28, %v3867_v28  ;;  %v482_v37 = vmul.f32 %v3869_v29, %v3869_v29 }
 0x11a   : > { %v3877_v38 = vsub.f32 %v431_v8, %v467_v34  ;;  %v3879_v39 = vsub.f32 %v432_v9, %v468_v35  ;;  %v490_v40 = vsel %vm437_vm0, %v480_v36, 0.0  ;;  %v496_v43 = vsel %vm437_vm0, %v482_v37, 0.0 }
 0x11b   : > { %494 = vadd.xlane.f32.xlu0 %v493_v33  ;;  %491 = vadd.xlane.f32.xlu1 %v490_v40  ;;  %v458_v41 = vpop.xlane.xlu0 %457  ;;  %v461_v42 = vpop.xlane.xlu1 %460 }
 0x11c   : > { %v469_v44 = vmul.f32 0.03125, %v458_v41  ;;  %v470_v45 = vmul.f32 0.03125, %v461_v42  ;;  %v483_v46 = vmul.f32 %v3877_v38, %v3877_v38  ;;  %v484_v47 = vmul.f32 %v3879_v39, %v3879_v39 }
 0x11e   : > { %v3887_v48 = vsub.f32 %v433_v12, %v469_v44  ;;  %v3889_v49 = vsub.f32 %v434_v13, %v470_v45  ;;  %v499_v50 = vsel %vm437_vm0, %v483_v46, 0.0  ;;  %v502_v51 = vsel %vm437_vm0, %v484_v47, 0.0 }
 0x11f   : > { %497 = vadd.xlane.f32.xlu1 %v496_v43  ;;  %500 = vadd.xlane.f32.xlu0 %v499_v50 }
 0x120   : > { %v485_v52 = vmul.f32 %v3887_v48, %v3887_v48  ;;  %v486_v53 = vmul.f32 %v3889_v49, %v3889_v49 }
 0x122   : > { %v505_v54 = vsel %vm437_vm0, %v485_v52, 0.0  ;;  %v508_v55 = vsel %vm437_vm0, %v486_v53, 0.0 }
 0x123   : > { %503 = vadd.xlane.f32.xlu1 %v502_v51  ;;  %506 = vadd.xlane.f32.xlu0 %v505_v54 }
 0x127   : > { %509 = vadd.xlane.f32.xlu1 %v508_v55 }
 0x1a0   : > { %v489_v60 = vpop.xlane.xlu0 %488 }
 0x1a1   : > { %v511_v61 = vmul.f32 0.03125, %v489_v60 }
 0x1a3   : > { %v519_v62 = vadd.f32 1e-05, %v511_v61 }
 0x1a4   : > { %v492_v63 = vpop.xlane.xlu1 %491  ;;  %v495_v0 = vpop.xlane.xlu0 %494 }
 0x1a5   : > { %3248 = vrsqrt.f32 %v519_v62  ;;  %v512_v1 = vmul.f32 0.03125, %v492_v63  ;;  %v513_v2 = vmul.f32 0.03125, %v495_v0 }
 0x1a7   : > { %v520_v3 = vadd.f32 1e-05, %v512_v1  ;;  %v521_v4 = vadd.f32 1e-05, %v513_v2 }
 0x1a8   : > { %v498_v5 = vpop.xlane.xlu1 %497  ;;  %v501_v6 = vpop.xlane.xlu0 %500 }
 0x1a9   : > { %3250 = vrsqrt.f32 %v520_v3  ;;  %v514_v7 = vmul.f32 0.03125, %v498_v5  ;;  %v515_v8 = vmul.f32 0.03125, %v501_v6  ;;  %v719_v6 = vstv %s4503_s14  ;;  %s4390_s14 = scalar_lea.hbm %s4449_s9, %s2892_s5 }
 0x1aa   : > { %3252 = vrsqrt.f32 %v521_v4  ;;  %vm727_vm2 = vcmp.lt.s32.totalorder %v719_v6, 0  ;;  %vm723_vm7 = vcmp.ge.s32.totalorder %v719_v6, 2 }
 0x1ab   : > { %v522_v9 = vadd.f32 1e-05, %v514_v7  ;;  %v523_v10 = vadd.f32 1e-05, %v515_v8  ;;  %v728_v7 = vsub.s32 0, %v719_v6 }
 0x1ac   : > { %v504_v11 = vpop.xlane.xlu1 %503  ;;  %v507_v12 = vpop.xlane.xlu0 %506 }
 0x1ad   : > { %3254 = vrsqrt.f32 %v522_v9  ;;  %v516_v13 = vmul.f32 0.03125, %v504_v11  ;;  %v517_v14 = vmul.f32 0.03125, %v507_v12  ;;  %v2822_v8 = vmin.u32 %v728_v7, %v719_v6 }
 0x1ae   : > { %3256 = vrsqrt.f32 %v523_v10  ;;  %v3978_v9 = vadd.s32 2, %v719_v6  ;;  %v3980_v11 = vadd.s32 1, %v719_v6 }
 0x1af   : > { %v524_v15 = vadd.f32 1e-05, %v516_v13  ;;  %v525_v16 = vadd.f32 1e-05, %v517_v14  ;;  %v731_v10 = vand.u32 1, %v2822_v8  ;;  %v3983_v14 = vadd.s32 3, %v719_v6 }
 0x1b0   : > { %v510_v17 = vpop.xlane.xlu1 %509  ;;  %v742_v12 = vsub.s32 0, %v3978_v9  ;;  %vm741_vm6 = vcmp.lt.s32.totalorder %v3978_v9, 0  ;;  %vm734_vm8 = vcmp.lt.s32.totalorder %v3980_v11, 0 }
 0x1b1   : > { %3258 = vrsqrt.f32 %v524_v15  ;;  %v518_v18 = vmul.f32 0.03125, %v510_v17  ;;  %v732_v13 = vsub.s32 0, %v731_v10  ;;  %v735_v15 = vsub.s32 0, %v3980_v11 }
 0x1b2   : > { %v3249_v19 = vpop.eup %3248  ;;  %3260 = vrsqrt.f32 %v525_v16  ;;  %v2824_v16 = vmin.u32 %v742_v12, %v3978_v9  ;;  %vm748_vm12 = vcmp.lt.s32.totalorder %v3983_v14, 0 }
 0x1b3   : > { %v526_v23 = vadd.f32 1e-05, %v518_v18  ;;  %v535_v24 = vmul.f32 %v3249_v19, %v3859_v20  ;;  %v733_v17 = vsel %vm727_vm2, %v732_v13, %v731_v10  ;;  %v749_v18 = vsub.s32 0, %v3983_v14 }
 0x1b4   : > { %v2823_v19 = vmin.u32 %v735_v15, %v3980_v11  ;;  %vm755_vm3 = vcmp.ne.s32.totalorder %v733_v17, 0  ;;  %vm759_vm4 = vcmp.lt.s32.totalorder %v733_v17, 0  ;;  %vm725_vm2 = vcmp.ge.s32.totalorder %v3978_v9, 2 }
 0x1b5   : > { %3262 = vrsqrt.f32 %v526_v23  ;;  %v549_v26 = vmul.f32 %v2808_v22, %v535_v24  ;;  %v2825_v23 = vmin.u32 %v749_v18, %v3983_v14  ;;  %v767_v24 = vadd.s32 2, %v733_v17  ;;  %vm763_vm5 = vmand %vm759_vm4, %vm755_vm3 }
 0x1b6   : > { %v3251_v27 = vpop.eup %3250 }
 0x1b7   : > { %v3253_v30 = vpop.eup %3252  ;;  %v563_v31 = vadd.f32 %v2809_v25, %v549_v26  ;;  %v536_v32 = vmul.f32 %v3251_v27, %v3867_v28  ;;  %v780_v27 = vld [vmem:[#allocation8 + $0x8] sm:$0xff] }
 0x1b8   : > { %v537_v33 = vmul.f32 %v3253_v30, %v3861_v21  ;;  %v752_v30 = vand.u32 1, %v2825_v23 }
 0x1b9   : > { %2989 = vmatprep.mubr.msk.f32.mxu0 %vm437_vm0, %v563_v31  ;;  %v550_v34 = vmul.f32 %v2808_v22, %v536_v32  ;;  %v771_v31 = vsel %vm763_vm5, %v767_v24, %v733_v17  ;;  %v3991_v32 = vld [vmem:[#allocation8] sm:$0xff] }
 0x1ba   : > { %v3255_v35 = vpop.eup %3254  ;;  %v551_v36 = vmul.f32 %v2808_v22, %v537_v33  ;;  %vm3996_vm9 = vcmp.eq.s32.totalorder %v771_v31, 1  ;;  %v793_v6 = vsel %vm725_vm2, %v3991_v32, 0.0 }
 0x1bb   : > { %v3257_v37 = vpop.eup %3256  ;;  %v564_v20 = vadd.f32 %v2809_v25, %v550_v34  ;;  %v538_v40 = vmul.f32 %v3255_v35, %v3869_v29  ;;  %v3994_v35 = vld [vmem:[#allocation7 + $0x8] sm:$0xff] }
 0x1bc   : > { %v565_v41 = vadd.f32 %v2809_v25, %v551_v36  ;;  %v539_v42 = vmul.f32 %v3257_v37, %v3877_v38  ;;  %v790_v36 = vsel %vm723_vm7, %v780_v27, 0.0 }
 0x1bd   : > { %2990 = vmatmul.mubr.msk.f32.vlgmr.msra.gmra.mxu0 %vm437_vm0, %v564_v20  ;;  %v552_v43 = vmul.f32 %v2808_v22, %v538_v40  ;;  %v4000_v20 = vld [vmem:[#allocation10 + $0x8] sm:$0xff]  ;;  %v789_v40 = vsel %vm723_vm7, %v3991_v32, 0.0 }
 0x1be   : > { %v3259_v44 = vpop.eup %3258  ;;  %2992 = vmatprep.mubr.msk.f32.mxu0 %vm437_vm0, %v565_v41  ;;  %v553_v28 = vmul.f32 %v2808_v22, %v539_v42  ;;  %v753_v41 = vsub.s32 0, %v752_v30  ;;  %v4003_v42 = vld [vmem:[#allocation7] sm:$0xff] }
 0x1bf   : > { %v3261_v21 = vpop.eup %3260  ;;  %v566_v45 = vadd.f32 %v2809_v25, %v552_v43  ;;  %v540_v46 = vmul.f32 %v3259_v44, %v3879_v39  ;;  %v798_v44 = vadd.f32 %v790_v36, %v3994_v35  ;;  %v801_v17 = vadd.f32 %v793_v6, %v4003_v42 }
 0x1c0   : > { %v567_v47 = vadd.f32 %v2809_v25, %v553_v28  ;;  %v541_v50 = vmul.f32 %v3261_v21, %v3887_v48  ;;  %v4007_v28 = vld [vmem:[#allocation10] sm:$0xff]  ;;  %v816_v21 = vsel %vm3996_vm9, %v4000_v20, 0.0 }
 0x1c1   : > { %2993 = vmatmul.mubr.msk.f32.gmra.mxu0 %vm437_vm0, %v566_v45  ;;  %v554_v29 = vmul.f32 %v2808_v22, %v540_v46  ;;  %v797_v46 = vadd.f32 %v789_v40, %v4003_v42 }
 0x1c2   : > { %v3263_v51 = vpop.eup %3262  ;;  %2995 = vmatprep.mubr.msk.f32.mxu1 %vm437_vm0, %v567_v47  ;;  %v555_v38 = vmul.f32 %v2808_v22, %v541_v50  ;;  %v754_v50 = vsel %vm748_vm12, %v753_v41, %v752_v30 }
 0x1c3   : > { %v568_v52 = vadd.f32 %v2809_v25, %v554_v29  ;;  %v542_v53 = vmul.f32 %v3263_v51, %v3889_v49  ;;  %v815_v29 = vsel %vm3996_vm9, %v4007_v28, 0.0  ;;  %v4020_v51 = vadd.f32 %v816_v21, %v798_v44 }
 0x1c4   : > { %v569_v54 = vadd.f32 %v2809_v25, %v555_v38  ;;  %vm758_vm4 = vcmp.ne.s32.totalorder %v754_v50, 0  ;;  %vm762_vm5 = vcmp.lt.s32.totalorder %v754_v50, 0  ;;  %vm726_vm9 = vcmp.ge.s32.totalorder %v3983_v14, 2 }
 0x1c5   : > { %2996 = vmatmul.mubr.msk.f32.vlgmr.msra.gmra.mxu1 %vm437_vm0, %v568_v52  ;;  %v556_v55 = vmul.f32 %v2808_v22, %v542_v53  ;;  %v745_v22 = vand.u32 1, %v2824_v16 }
 0x1c6   : > { %2998 = vmatprep.mubr.msk.f32.mxu1 %vm437_vm0, %v569_v54 }
 0x1c7   : > { %v570_v39 = vadd.f32 %v2809_v25, %v556_v55  ;;  %v738_v25 = vand.u32 1, %v2823_v19  ;;  %v746_v26 = vsub.s32 0, %v745_v22 }
 0x1c9   : > { %2999 = vmatmul.mubr.msk.f32.gmra.mxu1 %vm437_vm0, %v570_v39  ;;  %v739_v33 = vsub.s32 0, %v738_v25  ;;  %v747_v34 = vsel %vm741_vm6, %v746_v26, %v745_v22  ;;  %v4029_v39 = vadd.f32 %v815_v29, %v797_v46  ;;  %vm724_vm6 = vcmp.ge.s32.totalorder %v3980_v11, 2 }
 0x1ca   : > { %vm757_vm10 = vcmp.ne.s32.totalorder %v747_v34, 0  ;;  %vm761_vm11 = vcmp.lt.s32.totalorder %v747_v34, 0  ;;  %v769_v45 = vadd.s32 2, %v747_v34  ;;  %v792_v7 = vsel %vm724_vm6, %v780_v27, 0.0 }
 0x1cb   : > { %v740_v43 = vsel %vm734_vm8, %v739_v33, %v738_v25  ;;  %vm4013_vm13 = vmand %vm761_vm11, %vm757_vm10  ;;  %v800_v19 = vadd.f32 %v792_v7, %v3994_v35  ;;  %v796_v22 = vsel %vm726_vm9, %v780_v27, 0.0  ;;  %v791_v26 = vsel %vm724_vm6, %v3991_v32, 0.0 }
 0x1cc   : > { %vm756_vm14 = vcmp.ne.s32.totalorder %v740_v43, 0  ;;  %vm760_vm15 = vcmp.lt.s32.totalorder %v740_v43, 0  ;;  %v768_v38 = vadd.s32 2, %v740_v43  ;;  %v773_v53 = vsel %vm4013_vm13, %v769_v45, %v747_v34  ;;  %vm4043_vm8 = vmand %vm762_vm5, %vm758_vm4 }
 0x1cd   : > { %vm4025_vm3 = vmand %vm760_vm15, %vm756_vm14  ;;  %vm4037_vm7 = vcmp.eq.s32.totalorder %v773_v53, 1  ;;  %v799_v41 = vadd.f32 %v791_v26, %v4003_v42 }
 0x1ce   : > { %v820_v13 = vsel %vm4037_vm7, %v4000_v20, 0.0  ;;  %v819_v18 = vsel %vm4037_vm7, %v4007_v28, 0.0 }
 0x1cf   : > { %v4089_v34 = vadd.f32 %v819_v18, %v801_v17 }
 0x27d   : > { %v3921_v48 = vpop.f32.mrf.mxu0 }
 0x27e   : > { %835 = vrot.lane.b32.xlu0 %v3921_v48, %s3580_s20 }
 0x27f   : > { %v3924_v56 = vpop.f32.mrf.mxu0 }
 0x280   : > { %833 = vrot.lane.b32.xlu1 %v3924_v56, %s3580_s20  ;;  %3005 = vmatprep.mubr.msk.f32.mxu1 %vm837_vm1, %v3924_v56 }
 0x281   : > { %v3929_v49 = vpop.f32.mrf.mxu0 }
 0x283   : > { %v3935_v58 = vpop.f32.mrf.mxu0 }
 0x284   : > { %925 = vrot.lane.b32.xlu1 %v3929_v49, %s3580_s20 }
 0x285   : > { %v3932_v57 = vpop.f32.mrf.mxu1 }
 0x286   : > { %1014 = vrot.lane.b32.xlu0 %v3932_v57, %s3580_s20 }
 0x287   : > { %v3937_v59 = vpop.f32.mrf.mxu1 }
 0x288   : > { %923 = vrot.lane.b32.xlu1 %v3935_v58, %s3580_s20  ;;  %3019 = vmatprep.mubr.msk.f32.mxu0 %vm837_vm1, %v3937_v59 }
 0x289   : > { %v3942_v60 = vpop.f32.mrf.mxu1 }
 0x28a   : > { %1103 = vrot.lane.b32.xlu0 %v3942_v60, %s3580_s20 }
 0x28b   : > { %v3946_v61 = vpop.f32.mrf.mxu1 }
 0x28c   : > { %1012 = vrot.lane.b32.xlu1 %v3937_v59, %s3580_s20 }
 0x290   : > { %1101 = vrot.lane.b32.xlu1 %v3946_v61, %s3580_s20 }
 0x2f0   : > { %v836_v62 = vpop.permute.xlu0 %835 }
 0x2f1   : > { %3001 = vmatprep.subr.msk.mxu1 %vm837_vm1, %v836_v62 }
 0x2f2   : > { %v834_v63 = vpop.permute.xlu1 %833  ;;  %3002 = vmatpush3.xpose.msk.msra.mxu1 %vm837_vm1, %v836_v62 }
 0x2f3   : > { %3003 = vmatprep.subr.msk.mxu1 %vm837_vm1, %v834_v63 }
 0x2f6   : > { %v926_v0 = vpop.permute.xlu1 %925  ;;  %3004 = vmatpush3.xpose.msk.msra.mxu1 %vm837_vm1, %v834_v63  ;;  %v794_v63 = vsel %vm725_vm2, %v780_v27, 0.0  ;;  %v804_v27 = vadd.f32 %v796_v22, %v3994_v35 }
 0x2f7   : > { %3008 = vmatprep.subr.msk.mxu1 %vm837_vm1, %v926_v0  ;;  %v802_v12 = vadd.f32 %v794_v63, %v3994_v35  ;;  %v795_v35 = vsel %vm726_vm9, %v3991_v32, 0.0 }
 0x2f8   : > { %v1015_v1 = vpop.permute.xlu0 %1014 }
 0x2f9   : > { %3006 = vmatmul.mubr.msk.f32.vlgmr.msra.gmra.mxu1 %vm837_vm1, %v3921_v48  ;;  %3015 = vmatprep.subr.msk.mxu0 %vm837_vm1, %v1015_v1  ;;  %v4077_v23 = vadd.f32 %v820_v13, %v802_v12 }
 0x2fa   : > { %v924_v2 = vpop.permute.xlu1 %923  ;;  %3009 = vmatpush3.xpose.msk.msra.mxu1 %vm837_vm1, %v926_v0  ;;  %3012 = vmatprep.mubr.msk.f32.mxu1 %vm837_vm1, %v3935_v58  ;;  %v770_v0 = vadd.s32 2, %v754_v50 }
 0x2fb   : > { %3016 = vmatpush3.xpose.msk.msra.mxu0 %vm837_vm1, %v1015_v1  ;;  %3010 = vmatprep.subr.msk.mxu1 %vm837_vm1, %v924_v2 }
 0x2fc   : > { %v1104_v3 = vpop.permute.xlu0 %1103  ;;  %v774_v15 = vsel %vm4043_vm8, %v770_v0, %v754_v50 }
 0x2fd   : > { %vm4082_vm11 = vcmp.eq.s32.totalorder %v774_v15, 1 }
 0x2fe   : > { %v1013_v4 = vpop.permute.xlu1 %1012  ;;  %3011 = vmatpush3.xpose.msk.msra.mxu1 %vm837_vm1, %v924_v2  ;;  %v822_v40 = vsel %vm4082_vm11, %v4000_v20, 0.0 }
 0x2ff   : > { %3017 = vmatprep.subr.msk.mxu0 %vm837_vm1, %v1013_v4  ;;  %3022 = vmatprep.subr.msk.mxu1 %vm837_vm1, %v1104_v3 }
 0x300   : > { %3018 = vmatpush3.xpose.msk.msra.mxu0 %vm837_vm1, %v1013_v4  ;;  %v772_v4 = vsel %vm4025_vm3, %v768_v38, %v740_v43  ;;  %v803_v38 = vadd.f32 %v795_v35, %v4003_v42 }
 0x301   : > { %3013 = vmatmul.mubr.msk.f32.vlgmr.msra.gmra.mxu1 %vm837_vm1, %v3929_v49  ;;  %vm4062_vm10 = vcmp.eq.s32.totalorder %v772_v4, 1 }
 0x302   : > { %v1102_v5 = vpop.permute.xlu1 %1101  ;;  %3023 = vmatpush3.xpose.msk.msra.mxu1 %vm837_vm1, %v1104_v3  ;;  %3026 = vmatprep.mubr.msk.f32.mxu1 %vm837_vm1, %v3946_v61  ;;  %v818_v24 = vsel %vm4062_vm10, %v4000_v20, 0.0  ;;  %v817_v11 = vsel %vm4062_vm10, %v4007_v28, 0.0  ;;  %v4107_v20 = vadd.f32 %v822_v40, %v804_v27 }
 0x303   : > { %3020 = vmatmul.mubr.msk.f32.vlgmr.msra.gmra.mxu0 %vm837_vm1, %v3932_v57  ;;  %3024 = vmatprep.subr.msk.mxu1 %vm837_vm1, %v1102_v5  ;;  %v4092_v37 = vadd.f32 %v818_v24, %v800_v19  ;;  %v4109_v29 = vadd.f32 %v817_v11, %v799_v41 }
 0x306   : > { %3025 = vmatpush3.xpose.msk.msra.mxu1 %vm837_vm1, %v1102_v5 }
 0x309   : > { %3027 = vmatmul.mubr.msk.f32.vlgmr.msra.gmra.mxu1 %vm837_vm1, %v3942_v60 }
 0x3b9   : > { %v3007_v52 = vpop.f32.mrf.mxu1 }
 0x3ba   : > { %v1189_v55 = vmul.f32 0.25, %v3007_v52  ;;  %v821_v52 = vsel %vm4082_vm11, %v4007_v28, 0.0 }
 0x3bb   : > { %v912_v62 = vpop.f32.mrf.mxu1  ;;  %v4118_v63 = vadd.f32 %v821_v52, %v803_v38 }
 0x3bc   : > { %v1188_v1 = vmul.f32 0.25, %v912_v62  ;;  %v4035_v2 = vadd.f32 %v1189_v55, %v4020_v51 }
 0x3be   : > { %v1207_v8 = vsel %vm837_vm1, %v4035_v2, -inf  ;;  %v4055_v10 = vadd.f32 %v1188_v1, %v4029_v39 }
 0x3bf   : > { %1208 = vmax.xlane.f32.xlu1 %v1207_v8 }
 0x3c0   : > { %v1204_v16 = vsel %vm837_vm1, %v4055_v10, -inf }
 0x3c1   : > { %1205 = vmax.xlane.f32.xlu0 %v1204_v16  ;;  %v3014_v30 = vpop.f32.mrf.mxu1 }
 0x3c2   : > { %v1191_v43 = vmul.f32 0.25, %v3014_v30 }
 0x3c3   : > { %v3021_v31 = vpop.f32.mrf.mxu0  ;;  %v1001_v45 = vpop.f32.mrf.mxu1 }
 0x3c4   : > { %v1193_v33 = vmul.f32 0.25, %v3021_v31  ;;  %v1190_v53 = vmul.f32 0.25, %v1001_v45  ;;  %v1199_v54 = vadd.f32 %v1191_v43, %v4092_v37 }
 0x3c5   : > { %v1090_v36 = vpop.f32.mrf.mxu0 }
 0x3c6   : > { %v1192_v44 = vmul.f32 0.25, %v1090_v36  ;;  %v1201_v21 = vadd.f32 %v1193_v33, %v4077_v23  ;;  %v1213_v1 = vsel %vm837_vm1, %v1199_v54, -inf  ;;  %v1198_v3 = vadd.f32 %v1190_v53, %v4109_v29 }
 0x3c8   : > { %v1219_v46 = vsel %vm837_vm1, %v1201_v21, -inf  ;;  %v1200_v47 = vadd.f32 %v1192_v44, %v4089_v34  ;;  %v1210_v28 = vsel %vm837_vm1, %v1198_v3, -inf }
 0x3c9   : > { %1220 = vmax.xlane.f32.xlu1 %v1219_v46  ;;  %v3028_v50 = vpop.f32.mrf.mxu1 }
 0x3ca   : > { %v1195_v14 = vmul.f32 0.25, %v3028_v50  ;;  %v1216_v32 = vsel %vm837_vm1, %v1200_v47, -inf }
 0x3cb   : > { %1217 = vmax.xlane.f32.xlu0 %v1216_v32  ;;  %v1179_v55 = vpop.f32.mrf.mxu1 }
 0x3cc   : > { %v1203_v62 = vadd.f32 %v1195_v14, %v4107_v20  ;;  %v1194_v0 = vmul.f32 0.25, %v1179_v55 }
 0x3ce   : > { %v1225_v42 = vsel %vm837_vm1, %v1203_v62, -inf  ;;  %v4125_v4 = vadd.f32 %v1194_v0, %v4118_v63 }
 0x3cf   : > { %1214 = vmax.xlane.f32.xlu0 %v1213_v1  ;;  %1226 = vmax.xlane.f32.xlu1 %v1225_v42 }
 0x3d0   : > { %v1222_v5 = vsel %vm837_vm1, %v4125_v4, -inf }
 0x3d3   : > { %1211 = vmax.xlane.f32.xlu0 %v1210_v28 }
 0x3d7   : > { %1223 = vmax.xlane.f32.xlu0 %v1222_v5 }
 0x3e0   : > { %1292 = vrot.lane.b32.xlu1 %v3924_v56, %s3581_s29 }
 0x3e4   : > { %1381 = vrot.lane.b32.xlu1 %v3929_v49, %s3581_s29 }
 0x3e8   : > { %1468 = vrot.lane.b32.xlu1 %v3932_v57, %s3581_s29 }
 0x3ec   : > { %1466 = vrot.lane.b32.xlu1 %v3937_v59, %s3581_s29 }
 0x3ed   : > { %1294 = vrot.lane.b32.xlu0 %v3921_v48, %s3581_s29 }
 0x3f0   : > { %1646 = vrot.lane.b32.xlu1 %v3921_v48, %s3582_s16 }
 0x3f1   : > { %1379 = vrot.lane.b32.xlu0 %v3935_v58, %s3581_s29 }
 0x3f4   : > { %1644 = vrot.lane.b32.xlu1 %v3924_v56, %s3582_s16 }
 0x3f5   : > { %1555 = vrot.lane.b32.xlu0 %v3942_v60, %s3581_s29 }
 0x3f8   : > { %1640 = vrot.lane.b32.xlu1 %v3924_v56, %s3583_s24 }
 0x3f9   : > { %1553 = vrot.lane.b32.xlu0 %v3946_v61, %s3581_s29  ;;  %s3494_s29 = scalar_lea.vmem %s4392_s28, 1024 }
 0x3fa   : > { %p3495_p0 = scmp.ne.s32.totalorder %s4392_s28, %s3494_s29 }
 0x3fc   : > { %1735 = vrot.lane.b32.xlu1 %v3935_v58, %s3582_s16  ;;  %p3496_p5 = pnand %p3495_p0, %p4493_p13 }
 0x3fd   : > { %1737 = vrot.lane.b32.xlu0 %v3929_v49, %s3582_s16 }
 0x3fe   : > { %p3497_p9 = pneg %p3496_p5 }
 0x400   : > { %1731 = vrot.lane.b32.xlu1 %v3935_v58, %s3583_s24 }
 0x401   : > { %1642 = vrot.lane.b32.xlu0 %v3921_v48, %s3583_s24 }
 0x405   : > { %1828 = vrot.lane.b32.xlu0 %v3932_v57, %s3582_s16 }
 0x448   : > { %v1209_v6 = vpop.xlane.xlu1 %1208 }
 0x449   : > { %v1229_v7 = vsub.f32 %v4035_v2, %v1209_v6 }
 0x44a   : > { %v1206_v8 = vpop.xlane.xlu0 %1205 }
 0x44b   : > { %v1238_v12 = vmul.f32 1.442695, %v1229_v7  ;;  %v1228_v13 = vsub.f32 %v4055_v10, %v1206_v8 }
 0x44d   : > { %3264 = vpow2.f32 %v1238_v12  ;;  %v1236_v9 = vmul.f32 1.442695, %v1228_v13 }
 0x44f   : > { %3266 = vpow2.f32 %v1236_v9 }
 0x452   : > { %v1221_v15 = vpop.xlane.xlu1 %1220 }
 0x453   : > { %v1233_v16 = vsub.f32 %v1201_v21, %v1221_v15 }
 0x454   : > { %v1218_v17 = vpop.xlane.xlu0 %1217 }
 0x455   : > { %v1246_v18 = vmul.f32 1.442695, %v1233_v16  ;;  %v1232_v19 = vsub.f32 %v1200_v47, %v1218_v17 }
 0x457   : > { %3268 = vpow2.f32 %v1246_v18  ;;  %v1244_v22 = vmul.f32 1.442695, %v1232_v19 }
 0x458   : > { %v1227_v24 = vpop.xlane.xlu1 %1226  ;;  %v1215_v25 = vpop.xlane.xlu0 %1214 }
 0x459   : > { %3270 = vpow2.f32 %v1244_v22  ;;  %v1235_v26 = vsub.f32 %v1203_v62, %v1227_v24  ;;  %v1231_v30 = vsub.f32 %v1199_v54, %v1215_v25 }
 0x45a   : > { %v4155_v2 = vpop.eup %3264 }
 0x45b   : > { %v1250_v31 = vmul.f32 1.442695, %v1235_v26  ;;  %v1242_v33 = vmul.f32 1.442695, %v1231_v30  ;;  %v1255_v10 = vsel %vm837_vm1, %v4155_v2, 0.0 }
 0x45c   : > { %v4159_v27 = vpop.eup %3266  ;;  %1256 = vadd.xlane.f32.xlu1 %v1255_v10  ;;  %v1293_v36 = vpop.permute.xlu1 %1292 }
 0x45d   : > { %v1212_v40 = vpop.xlane.xlu0 %1211  ;;  %3272 = vpow2.f32 %v1250_v31  ;;  %v1252_v11 = vsel %vm837_vm1, %v4159_v27, 0.0 }
 0x45e   : > { %v1230_v41 = vsub.f32 %v1198_v3, %v1212_v40  ;;  %3274 = vpow2.f32 %v1242_v33  ;;  %1253 = vadd.xlane.f32.xlu0 %v1252_v11 }
 0x460   : > { %v1240_v43 = vmul.f32 1.442695, %v1230_v41  ;;  %v1382_v44 = vpop.permute.xlu1 %1381 }
 0x461   : > { %v1224_v21 = vpop.xlane.xlu0 %1223  ;;  %3036 = vmatprep.subr.mxu1 %v1382_v44 }
 0x462   : > { %3276 = vpow2.f32 %v1240_v43  ;;  %v1234_v35 = vsub.f32 %v4125_v4, %v1224_v21  ;;  %3037 = vmatpush3.msra.mxu1 %v1382_v44 }
 0x464   : > { %v1248_v45 = vmul.f32 1.442695, %v1234_v35  ;;  %v4164_v46 = vpop.eup %3268  ;;  %v1469_v52 = vpop.permute.xlu1 %1468 }
 0x465   : > { %v1295_v47 = vpop.permute.xlu0 %1294  ;;  %v1267_v50 = vsel %vm837_vm1, %v4164_v46, 0.0 }
 0x466   : > { %3278 = vpow2.f32 %v1248_v45  ;;  %3029 = vmatprep.subr.mxu0 %v1295_v47  ;;  %v4168_v38 = vpop.eup %3270  ;;  %1268 = vadd.xlane.f32.xlu1 %v1267_v50 }
 0x467   : > { %3030 = vmatpush3.msra.mxu0 %v1295_v47  ;;  %v1264_v14 = vsel %vm837_vm1, %v4168_v38, 0.0 }
 0x468   : > { %3031 = vmatprep.subr.mxu0 %v1293_v36  ;;  %v1467_v4 = vpop.permute.xlu1 %1466 }
 0x469   : > { %3032 = vmatpush3.msra.mxu0 %v1293_v36  ;;  %v1380_v53 = vpop.permute.xlu0 %1379 }
 0x46a   : > { %3038 = vmatprep.subr.mxu1 %v1380_v53  ;;  %3043 = vmatprep.subr.mxu0 %v1469_v52  ;;  %v4172_v32 = vpop.eup %3272 }
 0x46b   : > { %1265 = vadd.xlane.f32.xlu1 %v1264_v14  ;;  %3039 = vmatpush3.msra.mxu1 %v1380_v53  ;;  %v4174_v54 = vpop.eup %3274  ;;  %v1273_v0 = vsel %vm837_vm1, %v4172_v32, 0.0 }
 0x46c   : > { %v1261_v55 = vsel %vm837_vm1, %v4174_v54, 0.0  ;;  %v1647_v5 = vpop.permute.xlu1 %1646 }
 0x46d   : > { %v4178_v62 = vpop.permute.xlu0 %1555  ;;  %1262 = vadd.xlane.f32.xlu0 %v1261_v55 }
 0x46e   : > { %3050 = vmatprep.subr.mxu1 %v4178_v62 }
 0x46f   : > { %v4183_v1 = vpop.eup %3276  ;;  %1274 = vadd.xlane.f32.xlu1 %v1273_v0 }
 0x470   : > { %v1258_v42 = vsel %vm837_vm1, %v4183_v1, 0.0  ;;  %v1645_v6 = vpop.permute.xlu1 %1644 }
 0x471   : > { %1259 = vadd.xlane.f32.xlu0 %v1258_v42  ;;  %v1554_v7 = vpop.permute.xlu0 %1553 }
 0x473   : > { %v4187_v3 = vpop.eup %3278 }
 0x474   : > { %v1270_v28 = vsel %vm837_vm1, %v4187_v3, 0.0  ;;  %v1641_v8 = vpop.permute.xlu1 %1640 }
 0x475   : > { %1271 = vadd.xlane.f32.xlu0 %v1270_v28  ;;  %v4207_v12 = vpop.permute.xlu0 %1737 }
 0x478   : > { %v4209_v13 = vpop.permute.xlu1 %1735 }
 0x479   : > { %v1643_v9 = vpop.permute.xlu0 %1642 }
 0x47c   : > { %v4211_v15 = vpop.permute.xlu1 %1731 }
 0x47d   : > { %v1829_v16 = vpop.permute.xlu0 %1828 }
 0x480   : > { %1826 = vrot.lane.b32.xlu1 %v3937_v59, %s3582_s16 }
 0x484   : > { %1822 = vrot.lane.b32.xlu1 %v3937_v59, %s3583_s24 }
 0x488   : > { %1917 = vrot.lane.b32.xlu1 %v3946_v61, %s3582_s16 }
 0x48b   : > { %1733 = vrot.lane.b32.xlu0 %v3929_v49, %s3583_s24 }
 0x48c   : > { %1915 = vrot.lane.b32.xlu1 %v3942_v60, %s3583_s24 }
 0x48f   : > { %1919 = vrot.lane.b32.xlu0 %v3942_v60, %s3582_s16  ;;  %s3586_s16 = smov [#allocation13]  }
 0x493   : > { %1824 = vrot.lane.b32.xlu0 %v3932_v57, %s3583_s24 }
 0x497   : > { %1913 = vrot.lane.b32.xlu0 %v3946_v61, %s3583_s24  ;;  %s3498_s24 = sshll.u32 %s3586_s16, 4  ;;  %s3499_s24 = int_to_ptr.vmem [resolvable:$false] %s3498_s24 }
 0x498   : > { %p3501_p1 = scmp.lt.s32.totalorder %s4392_s28, %s3499_s24 }
 0x4e5   : > { %v1257_v17 = vpop.xlane.xlu1 %1256 }
 0x4e6   : > { %3280 = vrcp.f32 %v1257_v17 }
 0x4e7   : > { %v1254_v18 = vpop.xlane.xlu0 %1253 }
 0x4e8   : > { %3282 = vrcp.f32 %v1254_v18 }
 0x4ef   : > { %v1269_v19 = vpop.xlane.xlu1 %1268 }
 0x4f0   : > { %3284 = vrcp.f32 %v1269_v19 }
 0x4f3   : > { %v3281_v24 = vpop.eup %3280 }
 0x4f4   : > { %v1266_v22 = vpop.xlane.xlu1 %1265  ;;  %v1279_v31 = vmul.f32 %v3281_v24, %v4155_v2 }
 0x4f5   : > { %3286 = vrcp.f32 %v1266_v22  ;;  %v3283_v25 = vpop.eup %3282 }
 0x4f6   : > { %v1263_v26 = vpop.xlane.xlu0 %1262  ;;  %v1277_v30 = vmul.f32 %v3283_v25, %v4159_v27 }
 0x4f7   : > { %3288 = vrcp.f32 %v1263_v26 }
 0x4f8   : > { %3033 = vmatprep.mubr.msk.f32.mxu0 %vm837_vm1, %v1277_v30  ;;  %v1275_v10 = vpop.xlane.xlu1 %1274 }
 0x4f9   : > { %3034 = vmatmul.mubr.msk.f32.vlgmr.msra.gmra.mxu0 %vm837_vm1, %v1279_v31 }
 0x4fa   : > { %3044 = vmatpush3.msra.mxu0 %v1469_v52  ;;  %v1260_v33 = vpop.xlane.xlu0 %1259 }
 0x4fb   : > { %3290 = vrcp.f32 %v1260_v33  ;;  %3045 = vmatprep.subr.mxu0 %v1467_v4 }
 0x4fc   : > { %3046 = vmatpush3.msra.mxu0 %v1467_v4  ;;  %3292 = vrcp.f32 %v1275_v10  ;;  %v1827_v21 = vpop.permute.xlu1 %1826 }
 0x4fd   : > { %3057 = vmatprep.subr.msk.mxu0 %vm837_vm1, %v1647_v5  ;;  %v3285_v40 = vpop.eup %3284 }
 0x4fe   : > { %v1272_v36 = vpop.xlane.xlu0 %1271  ;;  %v1287_v41 = vmul.f32 %v3285_v40, %v4164_v46 }
 0x4ff   : > { %3294 = vrcp.f32 %v1272_v36 }
 0x500   : > { %v1823_v52 = vpop.permute.xlu1 %1822 }
 0x502   : > { %v3287_v27 = vpop.eup %3286  ;;  %v1734_v43 = vpop.permute.xlu0 %1733 }
 0x503   : > { %v1285_v2 = vmul.f32 %v3287_v27, %v4168_v38 }
 0x504   : > { %v3289_v11 = vpop.eup %3288 }
 0x505   : > { %3047 = vmatprep.mubr.msk.f32.mxu0 %vm837_vm1, %v1285_v2  ;;  %v1283_v45 = vmul.f32 %v3289_v11, %v4174_v54  ;;  %v1918_v54 = vpop.permute.xlu1 %1917 }
 0x506   : > { %3048 = vmatmul.mubr.msk.f32.vlgmr.msra.gmra.mxu0 %vm837_vm1, %v1287_v41  ;;  %v1920_v50 = vpop.permute.xlu0 %1919 }
 0x507   : > { %3058 = vmatpush3.xpose.msk.msra.mxu0 %vm837_vm1, %v1647_v5  ;;  %3061 = vmatprep.mubr.msk.f32.mxu0 %vm837_vm1, %v1641_v8 }
 0x508   : > { %3059 = vmatprep.subr.msk.mxu0 %vm837_vm1, %v1645_v6  ;;  %v3291_v44 = vpop.eup %3290 }
 0x509   : > { %v1281_v35 = vmul.f32 %v3291_v44, %v4183_v1  ;;  %v3293_v46 = vpop.eup %3292  ;;  %v1916_v55 = vpop.permute.xlu1 %1915 }
 0x50a   : > { %v1291_v53 = vmul.f32 %v3293_v46, %v4172_v32  ;;  %v1825_v14 = vpop.permute.xlu0 %1824 }
 0x50b   : > { %3060 = vmatpush3.xpose.msk.msra.mxu0 %vm837_vm1, %v1645_v6  ;;  %3040 = vmatprep.mubr.msk.f32.mxu1 %vm837_vm1, %v1281_v35 }
 0x50c   : > { %3071 = vmatprep.subr.msk.mxu0 %vm837_vm1, %v1829_v16  ;;  %v3295_v47 = vpop.eup %3294  ;;  %3041 = vmatmul.mubr.msk.f32.vlgmr.msra.gmra.mxu1 %vm837_vm1, %v1283_v45 }
 0x50d   : > { %3051 = vmatpush3.msra.mxu1 %v4178_v62  ;;  %v1289_v38 = vmul.f32 %v3295_v47, %v4187_v3 }
 0x50e   : > { %3062 = vmatmul.mubr.msk.f32.vlgmr.msra.gmra.mxu0 %vm837_vm1, %v1643_v9  ;;  %3052 = vmatprep.subr.mxu1 %v1554_v7  ;;  %v1914_v32 = vpop.permute.xlu0 %1913 }
 0x50f   : > { %3072 = vmatpush3.xpose.msk.msra.mxu0 %vm837_vm1, %v1829_v16  ;;  %3053 = vmatpush3.msra.mxu1 %v1554_v7 }
 0x510   : > { %3075 = vmatprep.mubr.msk.f32.mxu0 %vm837_vm1, %v1823_v52  ;;  %3054 = vmatprep.mubr.msk.f32.mxu1 %vm837_vm1, %v1289_v38 }
 0x511   : > { %3064 = vmatprep.subr.msk.mxu1 %vm837_vm1, %v4207_v12  ;;  %3073 = vmatprep.subr.msk.mxu0 %vm837_vm1, %v1827_v21 }
 0x512   : > { %3055 = vmatmul.mubr.msk.f32.vlgmr.msra.gmra.mxu1 %vm837_vm1, %v1291_v53 }
 0x513   : > { %3065 = vmatpush3.xpose.msk.msra.mxu1 %vm837_vm1, %v4207_v12  ;;  %3068 = vmatprep.mubr.msk.f32.mxu1 %vm837_vm1, %v4211_v15 }
 0x514   : > { %3066 = vmatprep.subr.msk.mxu1 %vm837_vm1, %v4209_v13  ;;  %3074 = vmatpush3.xpose.msk.msra.mxu0 %vm837_vm1, %v1827_v21 }
 0x517   : > { %3067 = vmatpush3.xpose.msk.msra.mxu1 %vm837_vm1, %v4209_v13  ;;  %3076 = vmatmul.mubr.msk.f32.vlgmr.msra.gmra.mxu0 %vm837_vm1, %v1825_v14 }
 0x518   : > { %3078 = vmatprep.subr.msk.mxu1 %vm837_vm1, %v1920_v50 }
 0x51a   : > { %3069 = vmatmul.mubr.msk.f32.vlgmr.msra.gmra.mxu1 %vm837_vm1, %v1734_v43 }
 0x51b   : > { %3079 = vmatpush3.xpose.msk.msra.mxu1 %vm837_vm1, %v1920_v50  ;;  %3082 = vmatprep.mubr.msk.f32.mxu1 %vm837_vm1, %v1914_v32 }
 0x51c   : > { %3080 = vmatprep.subr.msk.mxu1 %vm837_vm1, %v1918_v54 }
 0x51f   : > { %3081 = vmatpush3.xpose.msk.msra.mxu1 %vm837_vm1, %v1918_v54 }
 0x522   : > { %3083 = vmatmul.mubr.msk.f32.vlgmr.msra.gmra.mxu1 %vm837_vm1, %v1916_v55 }
 0x5b9   : > { %v4259_v62 = vpop.f32.mrf.mxu0 }
 0x5bb   : > { %v4261_v0 = vpop.f32.mrf.mxu0 }
 0x5c6   : > { %v4263_v1 = vpop.f32.mrf.mxu0 }
 0x5c8   : > { %v4265_v42 = vpop.f32.mrf.mxu0 }
 0x5cc   : > { %v4267_v3 = vpop.f32.mrf.mxu1 }
 0x5ce   : > { %v3063_v28 = vpop.f32.mrf.mxu0  ;;  %v4269_v5 = vpop.f32.mrf.mxu1 }
 0x5cf   : > { %v2005_v4 = vmul.f32 0.25, %v3063_v28 }
 0x5d0   : > { %v1722_v6 = vpop.f32.mrf.mxu0 }
 0x5d1   : > { %v2004_v7 = vmul.f32 0.25, %v1722_v6  ;;  %v2013_v8 = vadd.f32 %v2005_v4, %v4020_v51 }
 0x5d2   : > { %v4274_v9 = vpop.f32.mrf.mxu1 }
 0x5d3   : > { %v2023_v12 = vsel %vm837_vm1, %v2013_v8, -inf  ;;  %v2012_v13 = vadd.f32 %v2004_v7, %v4029_v39 }
 0x5d4   : > { %2024 = vmax.xlane.f32.xlu1 %v2023_v12  ;;  %v4277_v17 = vpop.f32.mrf.mxu1 }
 0x5d5   : > { %v2020_v15 = vsel %vm837_vm1, %v2012_v13, -inf }
 0x5d6   : > { %2021 = vmax.xlane.f32.xlu0 %v2020_v15 }
 0x5d7   : > { %v3077_v16 = vpop.f32.mrf.mxu0 }
 0x5d8   : > { %v2009_v18 = vmul.f32 0.25, %v3077_v16 }
 0x5d9   : > { %v1904_v25 = vpop.f32.mrf.mxu0 }
 0x5da   : > { %v3070_v19 = vpop.f32.mrf.mxu1  ;;  %v2017_v22 = vadd.f32 %v2009_v18, %v4077_v23  ;;  %v2008_v31 = vmul.f32 0.25, %v1904_v25 }
 0x5db   : > { %v2007_v24 = vmul.f32 0.25, %v3070_v19 }
 0x5dc   : > { %v1813_v51 = vpop.f32.mrf.mxu1  ;;  %v2035_v26 = vsel %vm837_vm1, %v2017_v22, -inf  ;;  %v2016_v23 = vadd.f32 %v2008_v31, %v4089_v34 }
 0x5dd   : > { %v2006_v30 = vmul.f32 0.25, %v1813_v51  ;;  %2036 = vmax.xlane.f32.xlu1 %v2035_v26  ;;  %v2015_v39 = vadd.f32 %v2007_v24, %v4092_v37 }
 0x5de   : > { %v2032_v43 = vsel %vm837_vm1, %v2016_v23, -inf }
 0x5df   : > { %v2029_v33 = vsel %vm837_vm1, %v2015_v39, -inf  ;;  %v2014_v10 = vadd.f32 %v2006_v30, %v4109_v29 }
 0x5e0   : > { %2030 = vmax.xlane.f32.xlu0 %v2029_v33 }
 0x5e1   : > { %v2026_v27 = vsel %vm837_vm1, %v2014_v10, -inf }
 0x5e2   : > { %v3084_v36 = vpop.f32.mrf.mxu1 }
 0x5e3   : > { %v2011_v40 = vmul.f32 0.25, %v3084_v36 }
 0x5e4   : > { %2027 = vmax.xlane.f32.xlu0 %v2026_v27  ;;  %v1995_v2 = vpop.f32.mrf.mxu1 }
 0x5e5   : > { %v2010_v41 = vmul.f32 0.25, %v1995_v2  ;;  %v2019_v11 = vadd.f32 %v2011_v40, %v4107_v20 }
 0x5e7   : > { %v2041_v37 = vsel %vm837_vm1, %v2019_v11, -inf  ;;  %v2018_v44 = vadd.f32 %v2010_v41, %v4118_v63 }
 0x5e8   : > { %2033 = vmax.xlane.f32.xlu0 %v2032_v43  ;;  %2042 = vmax.xlane.f32.xlu1 %v2041_v37 }
 0x5e9   : > { %v2038_v29 = vsel %vm837_vm1, %v2018_v44, -inf }
 0x5ec   : > { %2039 = vmax.xlane.f32.xlu0 %v2038_v29 }
 0x5f9   : > { %2108 = vrot.lane.b32.xlu1 %v3924_v56, %s3584_s25 }
 0x5fd   : > { %2197 = vrot.lane.b32.xlu1 %v3929_v49, %s3584_s25 }
 0x601   : > { %2195 = vrot.lane.b32.xlu1 %v3935_v58, %s3584_s25 }
 0x602   : > { %2110 = vrot.lane.b32.xlu0 %v3921_v48, %s3584_s25 }
 0x605   : > { %2282 = vrot.lane.b32.xlu1 %v3937_v59, %s3584_s25 }
 0x606   : > { %2284 = vrot.lane.b32.xlu0 %v3932_v57, %s3584_s25 }
 0x65d   : > { %v2025_v34 = vpop.xlane.xlu1 %2024 }
 0x65e   : > { %v2045_v20 = vsub.f32 %v2013_v8, %v2025_v34 }
 0x65f   : > { %v2022_v63 = vpop.xlane.xlu0 %2021 }
 0x660   : > { %v2054_v21 = vmul.f32 1.442695, %v2045_v20  ;;  %v2044_v56 = vsub.f32 %v2012_v13, %v2022_v63 }
 0x662   : > { %3296 = vpow2.f32 %v2054_v21  ;;  %v2052_v35 = vmul.f32 1.442695, %v2044_v56 }
 0x664   : > { %3298 = vpow2.f32 %v2052_v35 }
 0x666   : > { %v2037_v49 = vpop.xlane.xlu1 %2036 }
 0x667   : > { %v2049_v45 = vsub.f32 %v2017_v22, %v2037_v49 }
 0x669   : > { %v2062_v58 = vmul.f32 1.442695, %v2049_v45  ;;  %v2031_v46 = vpop.xlane.xlu0 %2030 }
 0x66a   : > { %v2047_v47 = vsub.f32 %v2015_v39, %v2031_v46 }
 0x66b   : > { %3300 = vpow2.f32 %v2062_v58 }
 0x66c   : > { %v2058_v48 = vmul.f32 1.442695, %v2047_v47 }
 0x66d   : > { %v2028_v50 = vpop.xlane.xlu0 %2027 }
 0x66e   : > { %3302 = vpow2.f32 %v2058_v48  ;;  %v2046_v52 = vsub.f32 %v2014_v10, %v2028_v50 }
 0x66f   : > { %v4303_v59 = vpop.eup %3296 }
 0x670   : > { %v2071_v57 = vsel %vm837_vm1, %v4303_v59, 0.0  ;;  %v2056_v6 = vmul.f32 1.442695, %v2046_v52  ;;  %v2499_v52 = vld [vmem:[#allocation11 + $0x18] sm:$0xff] }
 0x671   : > { %v3299_v38 = vpop.eup %3298  ;;  %v2043_v53 = vpop.xlane.xlu1 %2042  ;;  %2072 = vadd.xlane.f32.xlu1 %v2071_v57 }
 0x672   : > { %v2034_v14 = vpop.xlane.xlu0 %2033  ;;  %v2051_v32 = vsub.f32 %v2019_v11, %v2043_v53  ;;  %v2068_v55 = vsel %vm837_vm1, %v3299_v38, 0.0  ;;  %v2498_v53 = vld [vmem:[#allocation11 + $0x10] sm:$0xff] }
 0x673   : > { %v2048_v54 = vsub.f32 %v2016_v23, %v2034_v14  ;;  %2069 = vadd.xlane.f32.xlu0 %v2068_v55  ;;  %v2497_v14 = vld [vmem:[#allocation11 + $0x8] sm:$0xff] }
 0x674   : > { %v2066_v28 = vmul.f32 1.442695, %v2051_v32  ;;  %v2496_v32 = vld [vmem:[#allocation11] sm:$0xff] }
 0x675   : > { %v2060_v4 = vmul.f32 1.442695, %v2048_v54  ;;  %v2109_v7 = vpop.permute.xlu1 %2108 }
 0x676   : > { %v2040_v8 = vpop.xlane.xlu0 %2039  ;;  %3304 = vpow2.f32 %v2066_v28 }
 0x677   : > { %v2050_v12 = vsub.f32 %v2018_v44, %v2040_v8  ;;  %3306 = vpow2.f32 %v2060_v4 }
 0x678   : > { %v4308_v13 = vpop.eup %3300  ;;  %3308 = vpow2.f32 %v2056_v6 }
 0x679   : > { %v2064_v15 = vmul.f32 1.442695, %v2050_v12  ;;  %v2198_v16 = vpop.permute.xlu1 %2197  ;;  %v2083_v19 = vsel %vm837_vm1, %v4308_v13, 0.0 }
 0x67a   : > { %v2111_v18 = vpop.permute.xlu0 %2110  ;;  %3092 = vmatprep.subr.mxu1 %v2198_v16  ;;  %2084 = vadd.xlane.f32.xlu1 %v2083_v19 }
 0x67b   : > { %3085 = vmatprep.subr.mxu0 %v2111_v18  ;;  %v4312_v22 = vpop.eup %3302  ;;  %3093 = vmatpush3.msra.mxu1 %v2198_v16  ;;  %3310 = vpow2.f32 %v2064_v15 }
 0x67c   : > { %3086 = vmatpush3.msra.mxu0 %v2111_v18  ;;  %v2077_v51 = vsel %vm837_vm1, %v4312_v22, 0.0 }
 0x67d   : > { %3087 = vmatprep.subr.mxu0 %v2109_v7  ;;  %v2196_v24 = vpop.permute.xlu1 %2195 }
 0x67e   : > { %3088 = vmatpush3.msra.mxu0 %v2109_v7  ;;  %v2285_v25 = vpop.permute.xlu0 %2284  ;;  %3094 = vmatprep.subr.mxu1 %v2196_v24 }
 0x67f   : > { %3099 = vmatprep.subr.mxu0 %v2285_v25  ;;  %3095 = vmatpush3.msra.mxu1 %v2196_v24 }
 0x680   : > { %2078 = vadd.xlane.f32.xlu1 %v2077_v51 }
 0x681   : > { %v2283_v27 = vpop.permute.xlu1 %2282 }
 0x683   : > { %v3305_v26 = vpop.eup %3304 }
 0x684   : > { %v3307_v30 = vpop.eup %3306  ;;  %v2089_v39 = vsel %vm837_vm1, %v3305_v26, 0.0 }
 0x685   : > { %2090 = vadd.xlane.f32.xlu1 %v2089_v39  ;;  %v2080_v31 = vsel %vm837_vm1, %v3307_v30, 0.0  ;;  %v3309_v33 = vpop.eup %3308 }
 0x686   : > { %2081 = vadd.xlane.f32.xlu0 %v2080_v31  ;;  %v2074_v10 = vsel %vm837_vm1, %v3309_v33, 0.0 }
 0x688   : > { %v3311_v36 = vpop.eup %3310 }
 0x689   : > { %v2086_v40 = vsel %vm837_vm1, %v3311_v36, 0.0 }
 0x68a   : > { %2075 = vadd.xlane.f32.xlu0 %v2074_v10  ;;  %v3328_v10 = vld [vmem:[%s3825_s19 + $0x8] sm:$0xff] }
 0x68e   : > { %2087 = vadd.xlane.f32.xlu0 %v2086_v40 }
 0x696   : > { %2369 = vrot.lane.b32.xlu1 %v3946_v61, %s3584_s25 }
 0x6a4   : > { %2371 = vrot.lane.b32.xlu0 %v3942_v60, %s3584_s25  ;;  %s3500_s25 = scalar_lea.vmem %s3499_s24, 2048 }
 0x6a5   : > { %p3502_p3 = scmp.lt.s32.totalorder %s3500_s25, %s3494_s29 }
 0x6a7   : > { %p3503_p4 = por %p3502_p3, %p3501_p1 }
 0x6a9   : > { %p3504_p12 = pnand %p3503_p4, %p3497_p9 }
 0x6fa   : > { %v2073_v23 = vpop.xlane.xlu1 %2072 }
 0x6fb   : > { %3312 = vrcp.f32 %v2073_v23 }
 0x6fc   : > { %v2070_v2 = vpop.xlane.xlu0 %2069 }
 0x6fd   : > { %3314 = vrcp.f32 %v2070_v2 }
 0x703   : > { %v2085_v43 = vpop.xlane.xlu1 %2084 }
 0x704   : > { %3316 = vrcp.f32 %v2085_v43 }
 0x708   : > { %v3313_v41 = vpop.eup %3312 }
 0x709   : > { %v2095_v44 = vmul.f32 %v3313_v41, %v4303_v59  ;;  %v2079_v29 = vpop.xlane.xlu1 %2078  ;;  %v3330_v41 = vld [vmem:[%s3825_s19 + $0x18] sm:$0xff] }
 0x70a   : > { %v3315_v11 = vpop.eup %3314 }
 0x70b   : > { %v2093_v37 = vmul.f32 %v3315_v11, %v3299_v38 }
 0x70d   : > { %3089 = vmatprep.mubr.msk.f32.mxu0 %vm837_vm1, %v2093_v37 }
 0x70e   : > { %3090 = vmatmul.mubr.msk.f32.vlgmr.msra.gmra.mxu0 %vm837_vm1, %v2095_v44  ;;  %v2091_v34 = vpop.xlane.xlu1 %2090  ;;  %v3331_v44 = vld [vmem:[%s3825_s19 + $0x10] sm:$0xff] }
 0x70f   : > { %v2082_v61 = vpop.xlane.xlu0 %2081  ;;  %3100 = vmatpush3.msra.mxu0 %v2285_v25 }
 0x710   : > { %3318 = vrcp.f32 %v2082_v61  ;;  %3101 = vmatprep.subr.mxu0 %v2283_v27 }
 0x711   : > { %3102 = vmatpush3.msra.mxu0 %v2283_v27  ;;  %3320 = vrcp.f32 %v2079_v29  ;;  %v3317_v21 = vpop.eup %3316 }
 0x712   : > { %v2103_v49 = vmul.f32 %v3317_v21, %v4308_v13  ;;  %v2370_v59 = vpop.permute.xlu1 %2369  ;;  %3113 = vmatprep.subr.mxu0 %v2499_v52 }
 0x713   : > { %v2076_v60 = vpop.xlane.xlu0 %2075 }
 0x714   : > { %3322 = vrcp.f32 %v2076_v60 }
 0x715   : > { %3324 = vrcp.f32 %v2091_v34  ;;  %v3332_v34 = vld [vmem:[%s3825_s19 + $0x28] sm:$0xff] }
 0x717   : > { %v2088_v20 = vpop.xlane.xlu0 %2087 }
 0x718   : > { %3326 = vrcp.f32 %v2088_v20 }
 0x71b   : > { %v2372_v63 = vpop.permute.xlu0 %2371 }
 0x71c   : > { %3106 = vmatprep.subr.mxu1 %v2372_v63 }
 0x71d   : > { %v3319_v56 = vpop.eup %3318 }
 0x71e   : > { %v2101_v35 = vmul.f32 %v3319_v56, %v3307_v30  ;;  %v3321_v45 = vpop.eup %3320  ;;  %v3333_v56 = vld [vmem:[%s3825_s19 + $0x20] sm:$0xff] }
 0x71f   : > { %v2099_v47 = vmul.f32 %v3321_v45, %v4312_v22 }
 0x720   : > { %3103 = vmatprep.mubr.msk.f32.mxu0 %vm837_vm1, %v2101_v35 }
 0x721   : > { %v3323_v58 = vpop.eup %3322  ;;  %3104 = vmatmul.mubr.msk.f32.vlgmr.msra.gmra.mxu0 %vm837_vm1, %v2103_v49 }
 0x722   : > { %v2097_v46 = vmul.f32 %v3323_v58, %v3309_v33  ;;  %v3325_v48 = vpop.eup %3324  ;;  %3114 = vmatpush3.msra.mxu0 %v2499_v52  ;;  %v3334_v58 = vld [vmem:[%s3825_s19 + $0x38] sm:$0xff] }
 0x723   : > { %v2107_v38 = vmul.f32 %v3325_v48, %v3305_v26  ;;  %3115 = vmatprep.subr.mxu0 %v2498_v53  ;;  %v3335_v48 = vld [vmem:[%s3825_s19 + $0x30] sm:$0xff] }
 0x724   : > { %3096 = vmatprep.mubr.msk.f32.mxu1 %vm837_vm1, %v2097_v46  ;;  %3116 = vmatpush3.msra.mxu0 %v2498_v53 }
 0x725   : > { %v3327_v50 = vpop.eup %3326  ;;  %3097 = vmatmul.mubr.msk.f32.vlgmr.msra.gmra.mxu1 %vm837_vm1, %v2099_v47  ;;  %3117 = vmatprep.subr.mxu0 %v2497_v14 }
 0x726   : > { %3107 = vmatpush3.msra.mxu1 %v2372_v63  ;;  %v2105_v57 = vmul.f32 %v3327_v50, %v3311_v36  ;;  %3118 = vmatpush3.msra.mxu0 %v2497_v14 }
 0x727   : > { %3108 = vmatprep.subr.mxu1 %v2370_v59  ;;  %3119 = vmatprep.subr.mxu0 %v2496_v32 }
 0x728   : > { %3109 = vmatpush3.msra.mxu1 %v2370_v59  ;;  %3110 = vmatprep.mubr.msk.f32.mxu1 %vm837_vm1, %v2105_v57 }
 0x729   : > { %3111 = vmatmul.mubr.msk.f32.vlgmr.msra.gmra.mxu1 %vm837_vm1, %v2107_v38  ;;  %3120 = vmatpush3.msra.mxu0 %v2496_v32 }
 0x7ce   : > { %v3091_v54 = vpop.f32.mrf.mxu0 }
 0x7cf   : > { %2466 = vrot.lane.b32.xlu1 %v3091_v54, %s3585_s26 }
 0x7d0   : > { %v2186_v55 = vpop.f32.mrf.mxu0 }
 0x7d1   : > { %2464 = vrot.lane.b32.xlu0 %v2186_v55, %s3585_s26 }
 0x7e1   : > { %v3105_v4 = vpop.f32.mrf.mxu0 }
 0x7e3   : > { %v2360_v7 = vpop.f32.mrf.mxu0 }
 0x7e5   : > { %v3098_v28 = vpop.f32.mrf.mxu1 }
 0x7e6   : > { %2470 = vrot.lane.b32.xlu1 %v3098_v28, %s3585_s26 }
 0x7e7   : > { %v2273_v6 = vpop.f32.mrf.mxu1 }
 0x7e8   : > { %2468 = vrot.lane.b32.xlu0 %v2273_v6, %s3585_s26 }
 0x7e9   : > { %v3112_v8 = vpop.f32.mrf.mxu1 }
 0x7ea   : > { %2474 = vrot.lane.b32.xlu1 %v3105_v4, %s3585_s26 }
 0x7eb   : > { %v2447_v12 = vpop.f32.mrf.mxu1 }
 0x7ec   : > { %2472 = vrot.lane.b32.xlu0 %v2360_v7, %s3585_s26 }
 0x7ee   : > { %2478 = vrot.lane.b32.xlu1 %v3112_v8, %s3585_s26 }
 0x7f0   : > { %2476 = vrot.lane.b32.xlu0 %v2447_v12, %s3585_s26 }
 0x841   : > { %v2467_v13 = vpop.permute.xlu1 %2466 }
 0x842   : > { %v2489_v18 = vsel %vm837_vm1, %v4259_v62, %v2467_v13 }
 0x843   : > { %v2465_v15 = vpop.permute.xlu0 %2464 }
 0x844   : > { %v2488_v16 = vsel %vm837_vm1, %v4261_v0, %v2465_v15 }
 0x845   : > { %3121 = vmatprep.mubr.msk.f32.mxu0 %vm437_vm0, %v2488_v16 }
 0x846   : > { %3122 = vmatmul.mubr.msk.f32.vlgmr.msra.gmra.mxu0 %vm437_vm0, %v2489_v18 }
 0x858   : > { %v2471_v19 = vpop.permute.xlu1 %2470 }
 0x859   : > { %v2491_v25 = vsel %vm837_vm1, %v4267_v3, %v2471_v19 }
 0x85a   : > { %v2469_v22 = vpop.permute.xlu0 %2468 }
 0x85b   : > { %v2490_v24 = vsel %vm837_vm1, %v4269_v5, %v2469_v22 }
 0x85c   : > { %v2475_v51 = vpop.permute.xlu1 %2474  ;;  %3124 = vmatprep.mubr.msk.f32.mxu0 %vm437_vm0, %v2490_v24 }
 0x85d   : > { %3125 = vmatmul.mubr.msk.f32.gmra.mxu0 %vm437_vm0, %v2491_v25  ;;  %v2493_v26 = vsel %vm837_vm1, %v4263_v1, %v2475_v51  ;;  %v2874_v1 = vld [vmem:[%s4448_s8] ss:$0 sm:$0xff] }
 0x85e   : > { %v2473_v0 = vpop.permute.xlu0 %2472 }
 0x85f   : > { %v2492_v62 = vsel %vm837_vm1, %v4265_v42, %v2473_v0 }
 0x860   : > { %3127 = vmatprep.mubr.msk.f32.mxu0 %vm437_vm0, %v2492_v62  ;;  %v2479_v5 = vpop.permute.xlu1 %2478 }
 0x861   : > { %3128 = vmatmul.mubr.msk.f32.gmra.mxu0 %vm437_vm0, %v2493_v26  ;;  %v2495_v39 = vsel %vm837_vm1, %v4274_v9, %v2479_v5  ;;  %v3329_v9 = vld [vmem:[%s3825_s19] sm:$0xff] }
 0x862   : > { %v2477_v3 = vpop.permute.xlu0 %2476 }
 0x863   : > { %v2494_v30 = vsel %vm837_vm1, %v4277_v17, %v2477_v3 }
 0x864   : > { %3130 = vmatprep.mubr.msk.f32.mxu0 %vm437_vm0, %v2494_v30 }
 0x865   : > { %3131 = vmatmul.mubr.msk.f32.gmra.mxu0 %vm437_vm0, %v2495_v39 }
 0x906   : > { %v3123_v42 = vpop.f32.mrf.mxu0 }
 0x907   : > { %v2603_v31 = vadd.f32 %v3123_v42, %v2874_v1 }
 0x908   : > { %v2597_v33 = vpop.f32.mrf.mxu0 }
 0x909   : > { %v2637_v36 = vadd.f32 %v3328_v10, %v2603_v31  ;;  %v2598_v40 = vadd.f32 %v2874_v1, %v2597_v33 }
 0x90b   : > { %2645 = vst.msk [vmem:[%s4365_s18 + $0x8] sm:$0xff] %vm437_vm0, %v2637_v36  ;;  %v2636_v17 = vadd.f32 %v3329_v9, %v2598_v40 }
 0x90d   : > { %2644 = vst.msk [vmem:[%s4365_s18] sm:$0xff] %vm437_vm0, %v2636_v17 }
 0x91d   : > { %v3126_v27 = vpop.f32.mrf.mxu0 }
 0x91e   : > { %v2613_v23 = vadd.f32 %v3126_v27, %v2874_v1 }
 0x91f   : > { %v2607_v2 = vpop.f32.mrf.mxu0 }
 0x920   : > { %v2639_v11 = vadd.f32 %v3330_v41, %v2613_v23  ;;  %v2608_v43 = vadd.f32 %v2874_v1, %v2607_v2 }
 0x921   : > { %v3129_v37 = vpop.f32.mrf.mxu0 }
 0x922   : > { %2647 = vst.msk [vmem:[%s4365_s18 + $0x18] sm:$0xff] %vm437_vm0, %v2639_v11  ;;  %v2638_v61 = vadd.f32 %v3331_v44, %v2608_v43  ;;  %v2623_v29 = vadd.f32 %v3129_v37, %v2874_v1 }
 0x923   : > { %v2617_v60 = vpop.f32.mrf.mxu0 }
 0x924   : > { %2646 = vst.msk [vmem:[%s4365_s18 + $0x10] sm:$0xff] %vm437_vm0, %v2638_v61  ;;  %v2641_v20 = vadd.f32 %v3332_v34, %v2623_v29  ;;  %v2618_v63 = vadd.f32 %v2874_v1, %v2617_v60 }
 0x925   : > { %v3132_v21 = vpop.f32.mrf.mxu0 }
 0x926   : > { %2649 = vst.msk [vmem:[%s4365_s18 + $0x28] sm:$0xff] %vm437_vm0, %v2641_v20  ;;  %v2640_v35 = vadd.f32 %v3333_v56, %v2618_v63  ;;  %v2633_v49 = vadd.f32 %v3132_v21, %v2874_v1 }
 0x927   : > { %v2627_v45 = vpop.f32.mrf.mxu0 }
 0x928   : > { %2648 = vst.msk [vmem:[%s4365_s18 + $0x20] sm:$0xff] %vm437_vm0, %v2640_v35  ;;  %v2643_v46 = vadd.f32 %v3334_v58, %v2633_v49  ;;  %v2628_v47 = vadd.f32 %v2874_v1, %v2627_v45 }
 0x92a   : > { %2651 = vst.msk [vmem:[%s4365_s18 + $0x38] sm:$0xff] %vm437_vm0, %v2643_v46  ;;  %v2642_v50 = vadd.f32 %v3335_v48, %v2628_v47 }
 0x92c   : > { %2650 = vst.msk [vmem:[%s4365_s18 + $0x30] sm:$0xff] %vm437_vm0, %v2642_v50 }
 0x92d   : > { %3507 = shalt.err (!%p3504_p12)
}
 0x92e   : > { %s3508_s19 = scalar_lea.hbm %s4390_s14, 1024  ;;  %s3512_s17 = scalar_lea.hbm %s4449_s9, 2048 }
 0x92f   : > { %p3509_p6 = scmp.ne.s32.totalorder %s4390_s14, %s3508_s19  ;;  %p3513_p8 = scmp.lt.s32.totalorder %s4390_s14, %s4449_s9 }
 0x930   : > { %p3514_p10 = scmp.lt.s32.totalorder %s3512_s17, %s3508_s19 }
 0x931   : > { %p3510_p2 = pnand %p3509_p6, %p4493_p13 }
 0x932   : > { %p3515_p11 = por %p3514_p10, %p3513_p8 }
 0x933   : > { %p3511_p7 = pneg %p3510_p2 }
 0x935   : > { %p3516_p0 = pnand %p3515_p11, %p3511_p7 }
 0x937   : > { %3519 = shalt.err (!%p3516_p0)
}
 0x938   : > { %s3587_s13 = smov 128   ;;  %s3588_s3 = smov 8  }
 0x939   : > { %3163 = dma.vmem_to_hbm [thread:$0]  (%p4493_p13), %s4392_s28, 1024, %s4390_s14, %s2653_s15, %s3587_s13, %s3587_s13, %s3588_s3  }
 0x93a PF: > { %s2682_s29 = sand.u32 1, %s3558_s30   ;;  %p4494_p5 = scmp.ne.s32.totalorder %s4467_s21, 0 }
 0x93b   : > { %p4495_p9 = scmp.ge.s32.totalorder %s3570_s12, 2  ;;  %s2683_s16 = scalar_lea.sflag [#allocation4], %s2682_s29 }
 0x93d   : > { %p3186_p1 = pnand %p4495_p9, %p4494_p5 }
 0x93f   : > { %p3187_p3 = pneg %p3186_p1 }
 0x941   : > { %3553 = dma.done.wait (%p3187_p3), %s2683_s16, 1024  }
 0x942   : > { %3555 = vsyncadd (%p3187_p3), %s2683_s16, 4294966272  ;;  %p25_p4 = scmp.ge.s32.totalorder %s3750_s22, 4   ;;  %s4496_s30 = smov %s3562_s10 }
 0x943   : > { %s4497_s10 = smov %s3566_s11  ;;  %s4498_s11 = smov %s3762_s23 }
 0x944   : > { %s4499_s12 = smov %s3750_s22  ;;  %27 = sbr.rel (!%p25_p4) target bundleno = 12 (0xc), region = 121 }
 0x949   :  { %2688 = vsyncpa [#allocation3], 1 }
 0x94a   :  { %2690 = vsyncpa [#allocation3 + $0x1], 1 }
 0x94b   :  { %2691 = vsyncpa [#allocation6], 1 }
 0x94c   :  { %2692 = vsyncpa [#allocation9], 1 }
 0x94d   :  { %2693 = vsyncpa [#allocation12], 1 }
 0x94e   :  { %2694 = vsyncpa [#allocation4], 1 }
 0x94f   :  { %2696 = vsyncpa [#allocation4 + $0x1], 1 }

</bundles_post_ra>
